<compile_context>
chip_gen: v5e
topology: v5e:2x2
jax: 0.10.0
libtpu: 0.0.40
codegen_flags: <defaults>
</compile_context>

<pallas_src>
import functools
import re
from dataclasses import dataclass
from typing import Dict, List

import jax
import jax.numpy as jnp
from jax.experimental import pallas as pl
from jax.experimental.pallas import tpu as pltpu

# ---------------- model config (small, synthetic) ----------------
D_MODEL = 32
N_HEADS = 4
D_HEAD = 8
D_MLP = 64
N_LAYERS = 2
VOCAB = 50
N_CTX = 16
LN_EPS = 1e-5
HDH = N_HEADS * D_HEAD  # 32


# ---------------- Pallas kernel: all blocks fused ----------------
def _layernorm(x, w, b):
    mu = jnp.mean(x, axis=-1, keepdims=True)
    xc = x - mu
    var = jnp.mean(xc * xc, axis=-1, keepdims=True)
    return xc * jax.lax.rsqrt(var + LN_EPS) * w + b


def fused_blocks_kernel(
    resid_ref,                       # (1, S, D)      resid_pre of layer 0 (one batch row)
    ln1w_ref, ln1b_ref,              # (L, 1, D)
    wqkv_ref, bqkv_ref,              # (L, D, 3*HDH), (L, 1, 3*HDH)   fused QKV
    wo_ref, bo_ref,                  # (L, HDH, D),   (L, 1, D)
    ln2w_ref, ln2b_ref,              # (L, 1, D)
    win_ref, bin_ref,                # (L, D, D_MLP), (L, 1, D_MLP)
    wout_ref, bout_ref,              # (L, D_MLP, D), (L, 1, D)
    out_ref,                         # (1, S, L*(HDH+D))  packed [z_l | resid_post_l]*
    *, n_layers: int,
):
    x = resid_ref[0]                 # (S, D)
    S = x.shape[0]
    scale = 1.0 / (D_HEAD ** 0.5)

    # causal mask, shared across layers / heads
    row = jax.lax.broadcasted_iota(jnp.int32, (N_HEADS, S, S), 1)
    col = jax.lax.broadcasted_iota(jnp.int32, (N_HEADS, S, S), 2)
    causal = row >= col

    parts = []
    for l in range(n_layers):        # static unroll; weights indexed at trace time
        # --- attention ---
        x1 = _layernorm(x, ln1w_ref[l], ln1b_ref[l])
        qkv = jnp.dot(x1, wqkv_ref[l], preferred_element_type=jnp.float32) + bqkv_ref[l]
        q = qkv[:, 0 * HDH:1 * HDH]
        k = qkv[:, 1 * HDH:2 * HDH]
        v = qkv[:, 2 * HDH:3 * HDH]

        # (S, H*dh) -> (H, S, dh) so scores / z are single head-batched einsums
        qh = jnp.stack([q[:, h * D_HEAD:(h + 1) * D_HEAD] for h in range(N_HEADS)], axis=0)
        kh = jnp.stack([k[:, h * D_HEAD:(h + 1) * D_HEAD] for h in range(N_HEADS)], axis=0)
        vh = jnp.stack([v[:, h * D_HEAD:(h + 1) * D_HEAD] for h in range(N_HEADS)], axis=0)

        scores = jnp.einsum("hqd,hkd->hqk", qh, kh,
                            preferred_element_type=jnp.float32) * scale
        scores = jnp.where(causal, scores, -1e30)
        scores = scores - jnp.max(scores, axis=-1, keepdims=True)
        e = jnp.exp(scores)
        denom = jnp.sum(e, axis=-1, keepdims=True)
        pattern = e * pl.reciprocal(denom, approx=True)     # EUP reciprocal
        zh = jnp.einsum("hqk,hkd->hqd", pattern, vh,
                        preferred_element_type=jnp.float32)  # (H, S, dh)
        # flatten heads back -> (S, H*dh); matches hook_z.flatten(-2, -1)
        z = jnp.concatenate([zh[h] for h in range(N_HEADS)], axis=-1)

        attn_out = jnp.dot(z, wo_ref[l], preferred_element_type=jnp.float32) + bo_ref[l]
        resid_mid = x + attn_out

        # --- MLP ---
        x2 = _layernorm(resid_mid, ln2w_ref[l], ln2b_ref[l])
        pre = jnp.dot(x2, win_ref[l], preferred_element_type=jnp.float32) + bin_ref[l]
        post = jax.nn.gelu(pre, approximate=True)            # gelu_new-style tanh approx
        mlp_out = jnp.dot(post, wout_ref[l], preferred_element_type=jnp.float32) + bout_ref[l]
        x = resid_mid + mlp_out

        parts.append(z)
        parts.append(x)

    # one lane-dense store: (S, n_layers*(HDH+D)) -> 128 lanes for the demo config
    out_ref[0] = jnp.concatenate(parts, axis=-1)


_PARAM_ORDER = ("ln1_w", "ln1_b", "W_QKV", "b_QKV", "W_O", "b_O",
                "ln2_w", "ln2_b", "W_in", "b_in", "W_out", "b_out")


def run_fused_blocks(resid: jax.Array, blocks: Dict[str, jax.Array], n_layers: int):
    """Runs blocks 0..n_layers-1 in a single pallas_call.

    Returns packed activations of shape (B, S, n_layers*(HDH+D)) laid out as
    [z_0 | resid_post_0 | z_1 | resid_post_1 | ...] along the last dim.
    """
    assert n_layers >= 1
    B, S, D = resid.shape
    params = [blocks[name][:n_layers] for name in _PARAM_ORDER]  # each (L, ...)
    out_w = n_layers * (HDH + D)

    in_specs = [pl.BlockSpec((1, S, D), lambda b: (b, 0, 0))]
    in_specs += [pl.BlockSpec(p.shape, lambda b: (0, 0, 0)) for p in params]
    out_specs = pl.BlockSpec((1, S, out_w), lambda b: (b, 0, 0))

    return pl.pallas_call(
        functools.partial(fused_blocks_kernel, n_layers=n_layers),
        grid=(B,),
        in_specs=in_specs,
        out_specs=out_specs,
        out_shape=jax.ShapeDtypeStruct((B, S, out_w), jnp.float32),
        compiler_params=pltpu.CompilerParams(
            dimension_semantics=("parallel",),   # v7x: each TensorCore takes a batch row
        ),
    )(resid, *params)


# ---------------- synthetic "HookedTransformer" params ----------------
def init_params(key):
    def nrm(k, shape, scale=0.02):
        return (scale * jax.random.normal(k, shape)).astype(jnp.float32)

    keys = jax.random.split(key, 2 + N_LAYERS)
    ln1w, ln1b, ln2w, ln2b = [], [], [], []
    wqkv, bqkv, wo, bo = [], [], [], []
    win, bin_, wout, bout = [], [], [], []
    for layer in range(N_LAYERS):
        ks = jax.random.split(keys[2 + layer], 14)
        wq = nrm(ks[0], (D_MODEL, HDH))
        wk = nrm(ks[1], (D_MODEL, HDH))
        wv = nrm(ks[2], (D_MODEL, HDH))
        wqkv.append(jnp.concatenate([wq, wk, wv], axis=-1))     # fused (D, 3*HDH)
        bqkv.append(nrm(ks[3], (1, 3 * HDH)))
        wo.append(nrm(ks[4], (HDH, D_MODEL)))
        bo.append(nrm(ks[5], (1, D_MODEL)))
        win.append(nrm(ks[6], (D_MODEL, D_MLP)))
        bin_.append(nrm(ks[7], (1, D_MLP)))
        wout.append(nrm(ks[8], (D_MLP, D_MODEL)))
        bout.append(nrm(ks[9], (1, D_MODEL)))
        ln1w.append(1.0 + nrm(ks[10], (1, D_MODEL), 0.05))
        ln1b.append(nrm(ks[11], (1, D_MODEL), 0.02))
        ln2w.append(1.0 + nrm(ks[12], (1, D_MODEL), 0.05))
        ln2b.append(nrm(ks[13], (1, D_MODEL), 0.02))

    params = {
        "W_E": nrm(keys[0], (VOCAB, D_MODEL), 0.1),
        "W_pos": nrm(keys[1], (N_CTX, D_MODEL), 0.1),
        "blocks": {
            "ln1_w": jnp.stack(ln1w), "ln1_b": jnp.stack(ln1b),
            "W_QKV": jnp.stack(wqkv), "b_QKV": jnp.stack(bqkv),
            "W_O": jnp.stack(wo), "b_O": jnp.stack(bo),
            "ln2_w": jnp.stack(ln2w), "ln2_b": jnp.stack(ln2b),
            "W_in": jnp.stack(win), "b_in": jnp.stack(bin_),
            "W_out": jnp.stack(wout), "b_out": jnp.stack(bout),
        },
    }
    hook_dict = set()
    for layer in range(N_LAYERS):
        hook_dict.update({
            f"blocks.{layer}.hook_resid_pre",
            f"blocks.{layer}.attn.hook_z",
            f"blocks.{layer}.hook_resid_post",
        })
    return params, hook_dict


# ---------------- TransformerLensWrapper equivalent ----------------
@dataclass
class ActivationConfig:
    primary_hook_point: str
    auxiliary_hook_points: List[str]


class TransformerLensWrapper:
    """JAX/Pallas re-implementation of the TransformerLens wrapper forward."""

    def __init__(self, params, hook_dict, activation_config: ActivationConfig):
        self.params = params
        self.hook_dict = hook_dict
        self.activation_config = activation_config
        self.validate_hook_points()
        self.hook_layer = self.get_layer(activation_config.primary_hook_point)

    def validate_hook_points(self):
        assert self.activation_config.primary_hook_point in self.hook_dict, (
            f"Invalid hook point: {self.activation_config.primary_hook_point}")
        for hp in self.activation_config.auxiliary_hook_points:
            assert hp in self.hook_dict, f"Invalid hook point: {hp}"

    @staticmethod
    def get_layer(hook_point: str) -> int:
        m = re.match(r"blocks\.(\d+)\.", hook_point)
        assert m, (f"Error: expecting hook_point to be 'blocks.{{layer}}.{{...}}',"
                   f" but got {hook_point!r}")
        return int(m.group(1))

    def forward(self, tokens: jax.Array, return_logits: bool = True) -> Dict[str, jax.Array]:
        B, S = tokens.shape
        # embedding + positional embedding (glue, plain JAX)
        resid_pre0 = self.params["W_E"][tokens] + self.params["W_pos"][:S][None, :, :]

        # run blocks 0..hook_layer (stop_at_layer = hook_layer + 1) in ONE kernel
        n_run = self.hook_layer + 1
        packed = run_fused_blocks(resid_pre0, self.params["blocks"], n_run)

        # unpack lane-dense slab: [z_l | resid_post_l] per layer.
        # resid_pre[l] == resid_post[l-1] (resid_pre[0] is the embedding), so it
        # never needs a separate store from the kernel.
        stride = HDH + D_MODEL
        layer_acts = {}
        resid_pre = resid_pre0
        for l in range(n_run):
            z = packed[..., l * stride:l * stride + HDH]
            resid_post = packed[..., l * stride + HDH:(l + 1) * stride]
            layer_acts[f"blocks.{l}.hook_resid_pre"] = resid_pre
            layer_acts[f"blocks.{l}.attn.hook_z"] = z          # already flattened(-2,-1)
            layer_acts[f"blocks.{l}.hook_resid_post"] = resid_post
            resid_pre = resid_post

        hook_points = ([self.activation_config.primary_hook_point]
                       + list(self.activation_config.auxiliary_hook_points))
        activation_dict = {hp: layer_acts[hp] for hp in hook_points}
        if return_logits:
            # with stop_at_layer, run_with_hooks returns the residual stream
            activation_dict["output"] = resid_pre
        return activation_dict


# ---------------- plain-JAX reference (for numeric verification) ----------------
def reference_forward(params, tokens, n_run):
    blk = params["blocks"]
    S = tokens.shape[1]

    def ln(y, w, b):
        mu = jnp.mean(y, -1, keepdims=True)
        yc = y - mu
        var = jnp.mean(yc * yc, -1, keepdims=True)
        return yc * jax.lax.rsqrt(var + LN_EPS) * w + b

    x = params["W_E"][tokens] + params["W_pos"][:S][None, :, :]
    acts = {}
    mask = jnp.tril(jnp.ones((S, S), dtype=bool))
    for l in range(n_run):
        acts[f"blocks.{l}.hook_resid_pre"] = x
        x1 = ln(x, blk["ln1_w"][l], blk["ln1_b"][l])
        qkv = x1 @ blk["W_QKV"][l] + blk["b_QKV"][l]
        q, k, v = jnp.split(qkv, 3, axis=-1)
        B = q.shape[0]
        qh = q.reshape(B, S, N_HEADS, D_HEAD)
        kh = k.reshape(B, S, N_HEADS, D_HEAD)
        vh = v.reshape(B, S, N_HEADS, D_HEAD)
        scores = jnp.einsum("bqhd,bkhd->bhqk", qh, kh) / (D_HEAD ** 0.5)
        scores = jnp.where(mask, scores, -1e30)
        p = jax.nn.softmax(scores, axis=-1)
        zh = jnp.einsum("bhqk,bkhd->bqhd", p, vh)
        z = zh.reshape(B, S, HDH)
        attn_out = z @ blk["W_O"][l] + blk["b_O"][l]
        resid_mid = x + attn_out
        x2 = ln(resid_mid, blk["ln2_w"][l], blk["ln2_b"][l])
        mlp_out = (jax.nn.gelu(x2 @ blk["W_in"][l] + blk["b_in"][l], approximate=True)
                   @ blk["W_out"][l] + blk["b_out"][l])
        x = resid_mid + mlp_out
        acts[f"blocks.{l}.attn.hook_z"] = z
        acts[f"blocks.{l}.hook_resid_post"] = x
    acts["output"] = x
    return acts


# ---------------- driver ----------------
if __name__ == "__main__":
    key = jax.random.PRNGKey(0)
    k_params, k_tok = jax.random.split(key)
    params, hook_dict = init_params(k_params)

    cfg = ActivationConfig(
        primary_hook_point="blocks.1.hook_resid_post",
        auxiliary_hook_points=["blocks.1.attn.hook_z", "blocks.0.hook_resid_pre"],
    )
    wrapper = TransformerLensWrapper(params, hook_dict, cfg)

    B, S = 2, 8
    tokens = jax.random.randint(k_tok, (B, S), 0, VOCAB, dtype=jnp.int32)

    out = wrapper.forward(tokens, return_logits=True)
    out = jax.tree_util.tree_map(jax.block_until_ready, out)

    assert out["blocks.1.hook_resid_post"].shape == (B, S, D_MODEL)
    assert out["blocks.1.attn.hook_z"].shape == (B, S, N_HEADS * D_HEAD)
    assert out["blocks.0.hook_resid_pre"].shape == (B, S, D_MODEL)
    assert out["output"].shape == (B, S, D_MODEL)
    assert all(bool(jnp.all(jnp.isfinite(v))) for v in out.values())

    # numeric check vs plain-JAX reference (tolerance covers the approximate
    # EUP reciprocal used for the softmax denominator)
    ref = reference_forward(params, tokens, wrapper.hook_layer + 1)
    for name, val in out.items():
        err = float(jnp.max(jnp.abs(val - ref[name])))
        assert err < 1e-2, f"{name}: max abs err {err}"

    print("KERNEL_OK")
</pallas_src>

<mosaic_0001>
module attributes {stable_mosaic.version = 11 : i64} {
  func.func @fused_blocks_kernel(%arg0: i32, %arg1: memref<1x8x32xf32, #tpu.memory_space<vmem>>, %arg2: memref<2x1x32xf32, #tpu.memory_space<vmem>>, %arg3: memref<2x1x32xf32, #tpu.memory_space<vmem>>, %arg4: memref<2x32x96xf32, #tpu.memory_space<vmem>>, %arg5: memref<2x1x96xf32, #tpu.memory_space<vmem>>, %arg6: memref<2x32x32xf32, #tpu.memory_space<vmem>>, %arg7: memref<2x1x32xf32, #tpu.memory_space<vmem>>, %arg8: memref<2x1x32xf32, #tpu.memory_space<vmem>>, %arg9: memref<2x1x32xf32, #tpu.memory_space<vmem>>, %arg10: memref<2x32x64xf32, #tpu.memory_space<vmem>>, %arg11: memref<2x1x64xf32, #tpu.memory_space<vmem>>, %arg12: memref<2x64x32xf32, #tpu.memory_space<vmem>>, %arg13: memref<2x1x32xf32, #tpu.memory_space<vmem>>, %arg14: memref<1x8x128xf32, #tpu.memory_space<vmem>>) attributes {dimension_semantics = [#tpu.dimension_semantics<parallel>], iteration_bounds = array<i64: 2>, scalar_prefetch = 0 : i64, scratch_operands = 0 : i64, tpu.core_type = #tpu.core_type<tc>, window_params = [{transform_indices = @transform_0, window_bounds = array<i64: 1, 8, 32>}, {pipeline_mode = #tpu.pipeline_mode<synchronous>, transform_indices = @transform_1, window_bounds = array<i64: 2, 1, 32>}, {pipeline_mode = #tpu.pipeline_mode<synchronous>, transform_indices = @transform_2, window_bounds = array<i64: 2, 1, 32>}, {pipeline_mode = #tpu.pipeline_mode<synchronous>, transform_indices = @transform_3, window_bounds = array<i64: 2, 32, 96>}, {pipeline_mode = #tpu.pipeline_mode<synchronous>, transform_indices = @transform_4, window_bounds = array<i64: 2, 1, 96>}, {pipeline_mode = #tpu.pipeline_mode<synchronous>, transform_indices = @transform_5, window_bounds = array<i64: 2, 32, 32>}, {pipeline_mode = #tpu.pipeline_mode<synchronous>, transform_indices = @transform_6, window_bounds = array<i64: 2, 1, 32>}, {pipeline_mode = #tpu.pipeline_mode<synchronous>, transform_indices = @transform_7, window_bounds = array<i64: 2, 1, 32>}, {pipeline_mode = #tpu.pipeline_mode<synchronous>, transform_indices = @transform_8, window_bounds = array<i64: 2, 1, 32>}, {pipeline_mode = #tpu.pipeline_mode<synchronous>, transform_indices = @transform_9, window_bounds = array<i64: 2, 32, 64>}, {pipeline_mode = #tpu.pipeline_mode<synchronous>, transform_indices = @transform_10, window_bounds = array<i64: 2, 1, 64>}, {pipeline_mode = #tpu.pipeline_mode<synchronous>, transform_indices = @transform_11, window_bounds = array<i64: 2, 64, 32>}, {pipeline_mode = #tpu.pipeline_mode<synchronous>, transform_indices = @transform_12, window_bounds = array<i64: 2, 1, 32>}, {transform_indices = @transform_13, window_bounds = array<i64: 1, 8, 128>}]} {
    %c0 = arith.constant 0 : index
    %c0_0 = arith.constant 0 : index
    %c0_1 = arith.constant 0 : index
    %0 = vector.load %arg1[%c0, %c0_0, %c0_1] : memref<1x8x32xf32, #tpu.memory_space<vmem>>, vector<1x8x32xf32>
    %1 = vector.shape_cast %0 : vector<1x8x32xf32> to vector<8x32xf32>
    %2 = tpu.iota {dimensions = array<i32: 1>} : vector<4x8x8xi32>
    %3 = tpu.iota {dimensions = array<i32: 2>} : vector<4x8x8xi32>
    %4 = arith.cmpi sge, %2, %3 : vector<4x8x8xi32>
    %c0_2 = arith.constant 0 : index
    %c0_3 = arith.constant 0 : index
    %c0_4 = arith.constant 0 : index
    %5 = vector.load %arg2[%c0_2, %c0_3, %c0_4] : memref<2x1x32xf32, #tpu.memory_space<vmem>>, vector<1x1x32xf32>
    %6 = vector.shape_cast %5 : vector<1x1x32xf32> to vector<1x32xf32>
    %c0_5 = arith.constant 0 : index
    %c0_6 = arith.constant 0 : index
    %c0_7 = arith.constant 0 : index
    %7 = vector.load %arg3[%c0_5, %c0_6, %c0_7] : memref<2x1x32xf32, #tpu.memory_space<vmem>>, vector<1x1x32xf32>
    %8 = vector.shape_cast %7 : vector<1x1x32xf32> to vector<1x32xf32>
    %cst = arith.constant dense<0.000000e+00> : vector<8xf32>
    %9 = vector.multi_reduction <add>, %1, %cst [1] : vector<8x32xf32> to vector<8xf32>
    %10 = vector.shape_cast %9 : vector<8xf32> to vector<8x1xf32>
    %cst_8 = arith.constant 3.200000e+01 : f32
    %11 = vector.broadcast %cst_8 : f32 to vector<8x1xf32>
    %12 = arith.divf %10, %11 : vector<8x1xf32>
    %13 = vector.broadcast %12 : vector<8x1xf32> to vector<8x32xf32>
    %14 = arith.subf %1, %13 : vector<8x32xf32>
    %15 = arith.mulf %14, %14 : vector<8x32xf32>
    %cst_9 = arith.constant dense<0.000000e+00> : vector<8xf32>
    %16 = vector.multi_reduction <add>, %15, %cst_9 [1] : vector<8x32xf32> to vector<8xf32>
    %17 = vector.shape_cast %16 : vector<8xf32> to vector<8x1xf32>
    %cst_10 = arith.constant 3.200000e+01 : f32
    %18 = vector.broadcast %cst_10 : f32 to vector<8x1xf32>
    %19 = arith.divf %17, %18 : vector<8x1xf32>
    %cst_11 = arith.constant 9.99999974E-6 : f32
    %20 = vector.broadcast %cst_11 : f32 to vector<8x1xf32>
    %21 = arith.addf %19, %20 : vector<8x1xf32>
    %22 = math.rsqrt %21 : vector<8x1xf32>
    %23 = vector.broadcast %22 : vector<8x1xf32> to vector<8x32xf32>
    %24 = arith.mulf %14, %23 : vector<8x32xf32>
    %25 = vector.broadcast %6 : vector<1x32xf32> to vector<8x32xf32>
    %26 = arith.mulf %24, %25 : vector<8x32xf32>
    %27 = vector.broadcast %8 : vector<1x32xf32> to vector<8x32xf32>
    %28 = arith.addf %26, %27 : vector<8x32xf32>
    %c0_12 = arith.constant 0 : index
    %c0_13 = arith.constant 0 : index
    %c0_14 = arith.constant 0 : index
    %29 = vector.load %arg4[%c0_12, %c0_13, %c0_14] : memref<2x32x96xf32, #tpu.memory_space<vmem>>, vector<1x32x96xf32>
    %30 = vector.shape_cast %29 : vector<1x32x96xf32> to vector<32x96xf32>
    %cst_15 = arith.constant dense<0.000000e+00> : vector<8x96xf32>
    %31 = tpu.matmul %28, %30, %cst_15 {dimension_numbers = #tpu.dot_dimension_numbers<[1], [0], [0], [1], [0, 0, 1, 1], [], []>} : vector<8x32xf32>, vector<32x96xf32>, vector<8x96xf32> -> vector<8x96xf32>
    %c0_16 = arith.constant 0 : index
    %c0_17 = arith.constant 0 : index
    %c0_18 = arith.constant 0 : index
    %32 = vector.load %arg5[%c0_16, %c0_17, %c0_18] : memref<2x1x96xf32, #tpu.memory_space<vmem>>, vector<1x1x96xf32>
    %33 = vector.shape_cast %32 : vector<1x1x96xf32> to vector<1x96xf32>
    %34 = vector.broadcast %33 : vector<1x96xf32> to vector<8x96xf32>
    %35 = arith.addf %31, %34 : vector<8x96xf32>
    %36 = vector.extract_strided_slice %35 {offsets = [0, 0], sizes = [8, 32], strides = [1, 1]} : vector<8x96xf32> to vector<8x32xf32>
    %37 = vector.extract_strided_slice %35 {offsets = [0, 32], sizes = [8, 32], strides = [1, 1]} : vector<8x96xf32> to vector<8x32xf32>
    %38 = vector.extract_strided_slice %35 {offsets = [0, 64], sizes = [8, 32], strides = [1, 1]} : vector<8x96xf32> to vector<8x32xf32>
    %39 = vector.extract_strided_slice %36 {offsets = [0, 0], sizes = [8, 8], strides = [1, 1]} : vector<8x32xf32> to vector<8x8xf32>
    %40 = vector.extract_strided_slice %36 {offsets = [0, 8], sizes = [8, 8], strides = [1, 1]} : vector<8x32xf32> to vector<8x8xf32>
    %41 = vector.extract_strided_slice %36 {offsets = [0, 16], sizes = [8, 8], strides = [1, 1]} : vector<8x32xf32> to vector<8x8xf32>
    %42 = vector.extract_strided_slice %36 {offsets = [0, 24], sizes = [8, 8], strides = [1, 1]} : vector<8x32xf32> to vector<8x8xf32>
    %43 = vector.shape_cast %39 : vector<8x8xf32> to vector<1x8x8xf32>
    %44 = vector.shape_cast %40 : vector<8x8xf32> to vector<1x8x8xf32>
    %45 = vector.shape_cast %41 : vector<8x8xf32> to vector<1x8x8xf32>
    %46 = vector.shape_cast %42 : vector<8x8xf32> to vector<1x8x8xf32>
    %47 = tpu.concatenate %43, %44, %45, %46 in 0 : vector<1x8x8xf32>, vector<1x8x8xf32>, vector<1x8x8xf32>, vector<1x8x8xf32> -> vector<4x8x8xf32>
    %48 = vector.extract_strided_slice %37 {offsets = [0, 0], sizes = [8, 8], strides = [1, 1]} : vector<8x32xf32> to vector<8x8xf32>
    %49 = vector.extract_strided_slice %37 {offsets = [0, 8], sizes = [8, 8], strides = [1, 1]} : vector<8x32xf32> to vector<8x8xf32>
    %50 = vector.extract_strided_slice %37 {offsets = [0, 16], sizes = [8, 8], strides = [1, 1]} : vector<8x32xf32> to vector<8x8xf32>
    %51 = vector.extract_strided_slice %37 {offsets = [0, 24], sizes = [8, 8], strides = [1, 1]} : vector<8x32xf32> to vector<8x8xf32>
    %52 = vector.shape_cast %48 : vector<8x8xf32> to vector<1x8x8xf32>
    %53 = vector.shape_cast %49 : vector<8x8xf32> to vector<1x8x8xf32>
    %54 = vector.shape_cast %50 : vector<8x8xf32> to vector<1x8x8xf32>
    %55 = vector.shape_cast %51 : vector<8x8xf32> to vector<1x8x8xf32>
    %56 = tpu.concatenate %52, %53, %54, %55 in 0 : vector<1x8x8xf32>, vector<1x8x8xf32>, vector<1x8x8xf32>, vector<1x8x8xf32> -> vector<4x8x8xf32>
    %57 = vector.extract_strided_slice %38 {offsets = [0, 0], sizes = [8, 8], strides = [1, 1]} : vector<8x32xf32> to vector<8x8xf32>
    %58 = vector.extract_strided_slice %38 {offsets = [0, 8], sizes = [8, 8], strides = [1, 1]} : vector<8x32xf32> to vector<8x8xf32>
    %59 = vector.extract_strided_slice %38 {offsets = [0, 16], sizes = [8, 8], strides = [1, 1]} : vector<8x32xf32> to vector<8x8xf32>
    %60 = vector.extract_strided_slice %38 {offsets = [0, 24], sizes = [8, 8], strides = [1, 1]} : vector<8x32xf32> to vector<8x8xf32>
    %61 = vector.shape_cast %57 : vector<8x8xf32> to vector<1x8x8xf32>
    %62 = vector.shape_cast %58 : vector<8x8xf32> to vector<1x8x8xf32>
    %63 = vector.shape_cast %59 : vector<8x8xf32> to vector<1x8x8xf32>
    %64 = vector.shape_cast %60 : vector<8x8xf32> to vector<1x8x8xf32>
    %65 = tpu.concatenate %61, %62, %63, %64 in 0 : vector<1x8x8xf32>, vector<1x8x8xf32>, vector<1x8x8xf32>, vector<1x8x8xf32> -> vector<4x8x8xf32>
    "tpu.trace_start"() <{level = 10 : i32, message = "hqd,hkd->hqk"}> : () -> ()
    %cst_19 = arith.constant dense<0.000000e+00> : vector<4x8x8xf32>
    %66 = tpu.matmul %47, %56, %cst_19 {dimension_numbers = #tpu.dot_dimension_numbers<[2], [2], [1], [1], [0, 0, 0, 1, 1, 1], [0], [0]>} : vector<4x8x8xf32>, vector<4x8x8xf32>, vector<4x8x8xf32> -> vector<4x8x8xf32>
    "tpu.trace_stop"() : () -> ()
    %cst_20 = arith.constant 0.353553385 : f32
    %67 = vector.broadcast %cst_20 : f32 to vector<4x8x8xf32>
    %68 = arith.mulf %66, %67 : vector<4x8x8xf32>
    %cst_21 = arith.constant -1.000000e+30 : f32
    %69 = vector.broadcast %cst_21 : f32 to vector<4x8x8xf32>
    %70 = arith.select %4, %68, %69 : vector<4x8x8xi1>, vector<4x8x8xf32>
    %cst_22 = arith.constant dense<0xFF800000> : vector<4x8xf32>
    %71 = vector.multi_reduction <maximumf>, %70, %cst_22 [2] : vector<4x8x8xf32> to vector<4x8xf32>
    %72 = vector.shape_cast %71 : vector<4x8xf32> to vector<4x8x1xf32>
    %73 = vector.broadcast %72 : vector<4x8x1xf32> to vector<4x8x8xf32>
    %74 = arith.subf %70, %73 : vector<4x8x8xf32>
    %75 = math.exp %74 : vector<4x8x8xf32>
    %cst_23 = arith.constant dense<0.000000e+00> : vector<4x8xf32>
    %76 = vector.multi_reduction <add>, %75, %cst_23 [2] : vector<4x8x8xf32> to vector<4x8xf32>
    %77 = vector.shape_cast %76 : vector<4x8xf32> to vector<4x8x1xf32>
    %78 = tpu.reciprocal %77 {approx = true} : vector<4x8x1xf32> -> vector<4x8x1xf32>
    %79 = vector.broadcast %78 : vector<4x8x1xf32> to vector<4x8x8xf32>
    %80 = arith.mulf %75, %79 : vector<4x8x8xf32>
    "tpu.trace_start"() <{level = 10 : i32, message = "hqk,hkd->hqd"}> : () -> ()
    %cst_24 = arith.constant dense<0.000000e+00> : vector<4x8x8xf32>
    %81 = tpu.matmul %80, %65, %cst_24 {dimension_numbers = #tpu.dot_dimension_numbers<[2], [1], [1], [2], [0, 0, 0, 1, 1, 2], [0], [0]>} : vector<4x8x8xf32>, vector<4x8x8xf32>, vector<4x8x8xf32> -> vector<4x8x8xf32>
    "tpu.trace_stop"() : () -> ()
    %82 = vector.extract_strided_slice %81 {offsets = [0, 0, 0], sizes = [1, 8, 8], strides = [1, 1, 1]} : vector<4x8x8xf32> to vector<1x8x8xf32>
    %83 = vector.shape_cast %82 : vector<1x8x8xf32> to vector<8x8xf32>
    %84 = vector.extract_strided_slice %81 {offsets = [1, 0, 0], sizes = [1, 8, 8], strides = [1, 1, 1]} : vector<4x8x8xf32> to vector<1x8x8xf32>
    %85 = vector.shape_cast %84 : vector<1x8x8xf32> to vector<8x8xf32>
    %86 = vector.extract_strided_slice %81 {offsets = [2, 0, 0], sizes = [1, 8, 8], strides = [1, 1, 1]} : vector<4x8x8xf32> to vector<1x8x8xf32>
    %87 = vector.shape_cast %86 : vector<1x8x8xf32> to vector<8x8xf32>
    %88 = vector.extract_strided_slice %81 {offsets = [3, 0, 0], sizes = [1, 8, 8], strides = [1, 1, 1]} : vector<4x8x8xf32> to vector<1x8x8xf32>
    %89 = vector.shape_cast %88 : vector<1x8x8xf32> to vector<8x8xf32>
    %90 = tpu.concatenate %83, %85, %87, %89 in 1 : vector<8x8xf32>, vector<8x8xf32>, vector<8x8xf32>, vector<8x8xf32> -> vector<8x32xf32>
    %c0_25 = arith.constant 0 : index
    %c0_26 = arith.constant 0 : index
    %c0_27 = arith.constant 0 : index
    %91 = vector.load %arg6[%c0_25, %c0_26, %c0_27] : memref<2x32x32xf32, #tpu.memory_space<vmem>>, vector<1x32x32xf32>
    %92 = vector.shape_cast %91 : vector<1x32x32xf32> to vector<32x32xf32>
    %cst_28 = arith.constant dense<0.000000e+00> : vector<8x32xf32>
    %93 = tpu.matmul %90, %92, %cst_28 {dimension_numbers = #tpu.dot_dimension_numbers<[1], [0], [0], [1], [0, 0, 1, 1], [], []>} : vector<8x32xf32>, vector<32x32xf32>, vector<8x32xf32> -> vector<8x32xf32>
    %c0_29 = arith.constant 0 : index
    %c0_30 = arith.constant 0 : index
    %c0_31 = arith.constant 0 : index
    %94 = vector.load %arg7[%c0_29, %c0_30, %c0_31] : memref<2x1x32xf32, #tpu.memory_space<vmem>>, vector<1x1x32xf32>
    %95 = vector.shape_cast %94 : vector<1x1x32xf32> to vector<1x32xf32>
    %96 = vector.broadcast %95 : vector<1x32xf32> to vector<8x32xf32>
    %97 = arith.addf %93, %96 : vector<8x32xf32>
    %98 = arith.addf %1, %97 : vector<8x32xf32>
    %c0_32 = arith.constant 0 : index
    %c0_33 = arith.constant 0 : index
    %c0_34 = arith.constant 0 : index
    %99 = vector.load %arg8[%c0_32, %c0_33, %c0_34] : memref<2x1x32xf32, #tpu.memory_space<vmem>>, vector<1x1x32xf32>
    %100 = vector.shape_cast %99 : vector<1x1x32xf32> to vector<1x32xf32>
    %c0_35 = arith.constant 0 : index
    %c0_36 = arith.constant 0 : index
    %c0_37 = arith.constant 0 : index
    %101 = vector.load %arg9[%c0_35, %c0_36, %c0_37] : memref<2x1x32xf32, #tpu.memory_space<vmem>>, vector<1x1x32xf32>
    %102 = vector.shape_cast %101 : vector<1x1x32xf32> to vector<1x32xf32>
    %cst_38 = arith.constant dense<0.000000e+00> : vector<8xf32>
    %103 = vector.multi_reduction <add>, %98, %cst_38 [1] : vector<8x32xf32> to vector<8xf32>
    %104 = vector.shape_cast %103 : vector<8xf32> to vector<8x1xf32>
    %cst_39 = arith.constant 3.200000e+01 : f32
    %105 = vector.broadcast %cst_39 : f32 to vector<8x1xf32>
    %106 = arith.divf %104, %105 : vector<8x1xf32>
    %107 = vector.broadcast %106 : vector<8x1xf32> to vector<8x32xf32>
    %108 = arith.subf %98, %107 : vector<8x32xf32>
    %109 = arith.mulf %108, %108 : vector<8x32xf32>
    %cst_40 = arith.constant dense<0.000000e+00> : vector<8xf32>
    %110 = vector.multi_reduction <add>, %109, %cst_40 [1] : vector<8x32xf32> to vector<8xf32>
    %111 = vector.shape_cast %110 : vector<8xf32> to vector<8x1xf32>
    %cst_41 = arith.constant 3.200000e+01 : f32
    %112 = vector.broadcast %cst_41 : f32 to vector<8x1xf32>
    %113 = arith.divf %111, %112 : vector<8x1xf32>
    %cst_42 = arith.constant 9.99999974E-6 : f32
    %114 = vector.broadcast %cst_42 : f32 to vector<8x1xf32>
    %115 = arith.addf %113, %114 : vector<8x1xf32>
    %116 = math.rsqrt %115 : vector<8x1xf32>
    %117 = vector.broadcast %116 : vector<8x1xf32> to vector<8x32xf32>
    %118 = arith.mulf %108, %117 : vector<8x32xf32>
    %119 = vector.broadcast %100 : vector<1x32xf32> to vector<8x32xf32>
    %120 = arith.mulf %118, %119 : vector<8x32xf32>
    %121 = vector.broadcast %102 : vector<1x32xf32> to vector<8x32xf32>
    %122 = arith.addf %120, %121 : vector<8x32xf32>
    %c0_43 = arith.constant 0 : index
    %c0_44 = arith.constant 0 : index
    %c0_45 = arith.constant 0 : index
    %123 = vector.load %arg10[%c0_43, %c0_44, %c0_45] : memref<2x32x64xf32, #tpu.memory_space<vmem>>, vector<1x32x64xf32>
    %124 = vector.shape_cast %123 : vector<1x32x64xf32> to vector<32x64xf32>
    %cst_46 = arith.constant dense<0.000000e+00> : vector<8x64xf32>
    %125 = tpu.matmul %122, %124, %cst_46 {dimension_numbers = #tpu.dot_dimension_numbers<[1], [0], [0], [1], [0, 0, 1, 1], [], []>} : vector<8x32xf32>, vector<32x64xf32>, vector<8x64xf32> -> vector<8x64xf32>
    %c0_47 = arith.constant 0 : index
    %c0_48 = arith.constant 0 : index
    %c0_49 = arith.constant 0 : index
    %126 = vector.load %arg11[%c0_47, %c0_48, %c0_49] : memref<2x1x64xf32, #tpu.memory_space<vmem>>, vector<1x1x64xf32>
    %127 = vector.shape_cast %126 : vector<1x1x64xf32> to vector<1x64xf32>
    %128 = vector.broadcast %127 : vector<1x64xf32> to vector<8x64xf32>
    %129 = arith.addf %125, %128 : vector<8x64xf32>
    %130 = arith.mulf %129, %129 : vector<8x64xf32>
    %131 = arith.mulf %129, %130 : vector<8x64xf32>
    %cst_50 = arith.constant 4.471500e-02 : f32
    %132 = vector.broadcast %cst_50 : f32 to vector<8x64xf32>
    %133 = arith.mulf %132, %131 : vector<8x64xf32>
    %134 = arith.addf %129, %133 : vector<8x64xf32>
    %cst_51 = arith.constant 0.797884583 : f32
    %135 = vector.broadcast %cst_51 : f32 to vector<8x64xf32>
    %136 = arith.mulf %135, %134 : vector<8x64xf32>
    %137 = math.tanh %136 : vector<8x64xf32>
    %cst_52 = arith.constant 1.000000e+00 : f32
    %138 = vector.broadcast %cst_52 : f32 to vector<8x64xf32>
    %139 = arith.addf %138, %137 : vector<8x64xf32>
    %cst_53 = arith.constant 5.000000e-01 : f32
    %140 = vector.broadcast %cst_53 : f32 to vector<8x64xf32>
    %141 = arith.mulf %140, %139 : vector<8x64xf32>
    %142 = arith.mulf %129, %141 : vector<8x64xf32>
    %c0_54 = arith.constant 0 : index
    %c0_55 = arith.constant 0 : index
    %c0_56 = arith.constant 0 : index
    %143 = vector.load %arg12[%c0_54, %c0_55, %c0_56] : memref<2x64x32xf32, #tpu.memory_space<vmem>>, vector<1x64x32xf32>
    %144 = vector.shape_cast %143 : vector<1x64x32xf32> to vector<64x32xf32>
    %cst_57 = arith.constant dense<0.000000e+00> : vector<8x32xf32>
    %145 = tpu.matmul %142, %144, %cst_57 {dimension_numbers = #tpu.dot_dimension_numbers<[1], [0], [0], [1], [0, 0, 1, 1], [], []>} : vector<8x64xf32>, vector<64x32xf32>, vector<8x32xf32> -> vector<8x32xf32>
    %c0_58 = arith.constant 0 : index
    %c0_59 = arith.constant 0 : index
    %c0_60 = arith.constant 0 : index
    %146 = vector.load %arg13[%c0_58, %c0_59, %c0_60] : memref<2x1x32xf32, #tpu.memory_space<vmem>>, vector<1x1x32xf32>
    %147 = vector.shape_cast %146 : vector<1x1x32xf32> to vector<1x32xf32>
    %148 = vector.broadcast %147 : vector<1x32xf32> to vector<8x32xf32>
    %149 = arith.addf %145, %148 : vector<8x32xf32>
    %150 = arith.addf %98, %149 : vector<8x32xf32>
    %c1 = arith.constant 1 : index
    %c0_61 = arith.constant 0 : index
    %c0_62 = arith.constant 0 : index
    %151 = vector.load %arg2[%c1, %c0_61, %c0_62] : memref<2x1x32xf32, #tpu.memory_space<vmem>>, vector<1x1x32xf32>
    %152 = vector.shape_cast %151 : vector<1x1x32xf32> to vector<1x32xf32>
    %c1_63 = arith.constant 1 : index
    %c0_64 = arith.constant 0 : index
    %c0_65 = arith.constant 0 : index
    %153 = vector.load %arg3[%c1_63, %c0_64, %c0_65] : memref<2x1x32xf32, #tpu.memory_space<vmem>>, vector<1x1x32xf32>
    %154 = vector.shape_cast %153 : vector<1x1x32xf32> to vector<1x32xf32>
    %cst_66 = arith.constant dense<0.000000e+00> : vector<8xf32>
    %155 = vector.multi_reduction <add>, %150, %cst_66 [1] : vector<8x32xf32> to vector<8xf32>
    %156 = vector.shape_cast %155 : vector<8xf32> to vector<8x1xf32>
    %cst_67 = arith.constant 3.200000e+01 : f32
    %157 = vector.broadcast %cst_67 : f32 to vector<8x1xf32>
    %158 = arith.divf %156, %157 : vector<8x1xf32>
    %159 = vector.broadcast %158 : vector<8x1xf32> to vector<8x32xf32>
    %160 = arith.subf %150, %159 : vector<8x32xf32>
    %161 = arith.mulf %160, %160 : vector<8x32xf32>
    %cst_68 = arith.constant dense<0.000000e+00> : vector<8xf32>
    %162 = vector.multi_reduction <add>, %161, %cst_68 [1] : vector<8x32xf32> to vector<8xf32>
    %163 = vector.shape_cast %162 : vector<8xf32> to vector<8x1xf32>
    %cst_69 = arith.constant 3.200000e+01 : f32
    %164 = vector.broadcast %cst_69 : f32 to vector<8x1xf32>
    %165 = arith.divf %163, %164 : vector<8x1xf32>
    %cst_70 = arith.constant 9.99999974E-6 : f32
    %166 = vector.broadcast %cst_70 : f32 to vector<8x1xf32>
    %167 = arith.addf %165, %166 : vector<8x1xf32>
    %168 = math.rsqrt %167 : vector<8x1xf32>
    %169 = vector.broadcast %168 : vector<8x1xf32> to vector<8x32xf32>
    %170 = arith.mulf %160, %169 : vector<8x32xf32>
    %171 = vector.broadcast %152 : vector<1x32xf32> to vector<8x32xf32>
    %172 = arith.mulf %170, %171 : vector<8x32xf32>
    %173 = vector.broadcast %154 : vector<1x32xf32> to vector<8x32xf32>
    %174 = arith.addf %172, %173 : vector<8x32xf32>
    %c1_71 = arith.constant 1 : index
    %c0_72 = arith.constant 0 : index
    %c0_73 = arith.constant 0 : index
    %175 = vector.load %arg4[%c1_71, %c0_72, %c0_73] : memref<2x32x96xf32, #tpu.memory_space<vmem>>, vector<1x32x96xf32>
    %176 = vector.shape_cast %175 : vector<1x32x96xf32> to vector<32x96xf32>
    %cst_74 = arith.constant dense<0.000000e+00> : vector<8x96xf32>
    %177 = tpu.matmul %174, %176, %cst_74 {dimension_numbers = #tpu.dot_dimension_numbers<[1], [0], [0], [1], [0, 0, 1, 1], [], []>} : vector<8x32xf32>, vector<32x96xf32>, vector<8x96xf32> -> vector<8x96xf32>
    %c1_75 = arith.constant 1 : index
    %c0_76 = arith.constant 0 : index
    %c0_77 = arith.constant 0 : index
    %178 = vector.load %arg5[%c1_75, %c0_76, %c0_77] : memref<2x1x96xf32, #tpu.memory_space<vmem>>, vector<1x1x96xf32>
    %179 = vector.shape_cast %178 : vector<1x1x96xf32> to vector<1x96xf32>
    %180 = vector.broadcast %179 : vector<1x96xf32> to vector<8x96xf32>
    %181 = arith.addf %177, %180 : vector<8x96xf32>
    %182 = vector.extract_strided_slice %181 {offsets = [0, 0], sizes = [8, 32], strides = [1, 1]} : vector<8x96xf32> to vector<8x32xf32>
    %183 = vector.extract_strided_slice %181 {offsets = [0, 32], sizes = [8, 32], strides = [1, 1]} : vector<8x96xf32> to vector<8x32xf32>
    %184 = vector.extract_strided_slice %181 {offsets = [0, 64], sizes = [8, 32], strides = [1, 1]} : vector<8x96xf32> to vector<8x32xf32>
    %185 = vector.extract_strided_slice %182 {offsets = [0, 0], sizes = [8, 8], strides = [1, 1]} : vector<8x32xf32> to vector<8x8xf32>
    %186 = vector.extract_strided_slice %182 {offsets = [0, 8], sizes = [8, 8], strides = [1, 1]} : vector<8x32xf32> to vector<8x8xf32>
    %187 = vector.extract_strided_slice %182 {offsets = [0, 16], sizes = [8, 8], strides = [1, 1]} : vector<8x32xf32> to vector<8x8xf32>
    %188 = vector.extract_strided_slice %182 {offsets = [0, 24], sizes = [8, 8], strides = [1, 1]} : vector<8x32xf32> to vector<8x8xf32>
    %189 = vector.shape_cast %185 : vector<8x8xf32> to vector<1x8x8xf32>
    %190 = vector.shape_cast %186 : vector<8x8xf32> to vector<1x8x8xf32>
    %191 = vector.shape_cast %187 : vector<8x8xf32> to vector<1x8x8xf32>
    %192 = vector.shape_cast %188 : vector<8x8xf32> to vector<1x8x8xf32>
    %193 = tpu.concatenate %189, %190, %191, %192 in 0 : vector<1x8x8xf32>, vector<1x8x8xf32>, vector<1x8x8xf32>, vector<1x8x8xf32> -> vector<4x8x8xf32>
    %194 = vector.extract_strided_slice %183 {offsets = [0, 0], sizes = [8, 8], strides = [1, 1]} : vector<8x32xf32> to vector<8x8xf32>
    %195 = vector.extract_strided_slice %183 {offsets = [0, 8], sizes = [8, 8], strides = [1, 1]} : vector<8x32xf32> to vector<8x8xf32>
    %196 = vector.extract_strided_slice %183 {offsets = [0, 16], sizes = [8, 8], strides = [1, 1]} : vector<8x32xf32> to vector<8x8xf32>
    %197 = vector.extract_strided_slice %183 {offsets = [0, 24], sizes = [8, 8], strides = [1, 1]} : vector<8x32xf32> to vector<8x8xf32>
    %198 = vector.shape_cast %194 : vector<8x8xf32> to vector<1x8x8xf32>
    %199 = vector.shape_cast %195 : vector<8x8xf32> to vector<1x8x8xf32>
    %200 = vector.shape_cast %196 : vector<8x8xf32> to vector<1x8x8xf32>
    %201 = vector.shape_cast %197 : vector<8x8xf32> to vector<1x8x8xf32>
    %202 = tpu.concatenate %198, %199, %200, %201 in 0 : vector<1x8x8xf32>, vector<1x8x8xf32>, vector<1x8x8xf32>, vector<1x8x8xf32> -> vector<4x8x8xf32>
    %203 = vector.extract_strided_slice %184 {offsets = [0, 0], sizes = [8, 8], strides = [1, 1]} : vector<8x32xf32> to vector<8x8xf32>
    %204 = vector.extract_strided_slice %184 {offsets = [0, 8], sizes = [8, 8], strides = [1, 1]} : vector<8x32xf32> to vector<8x8xf32>
    %205 = vector.extract_strided_slice %184 {offsets = [0, 16], sizes = [8, 8], strides = [1, 1]} : vector<8x32xf32> to vector<8x8xf32>
    %206 = vector.extract_strided_slice %184 {offsets = [0, 24], sizes = [8, 8], strides = [1, 1]} : vector<8x32xf32> to vector<8x8xf32>
    %207 = vector.shape_cast %203 : vector<8x8xf32> to vector<1x8x8xf32>
    %208 = vector.shape_cast %204 : vector<8x8xf32> to vector<1x8x8xf32>
    %209 = vector.shape_cast %205 : vector<8x8xf32> to vector<1x8x8xf32>
    %210 = vector.shape_cast %206 : vector<8x8xf32> to vector<1x8x8xf32>
    %211 = tpu.concatenate %207, %208, %209, %210 in 0 : vector<1x8x8xf32>, vector<1x8x8xf32>, vector<1x8x8xf32>, vector<1x8x8xf32> -> vector<4x8x8xf32>
    "tpu.trace_start"() <{level = 10 : i32, message = "hqd,hkd->hqk"}> : () -> ()
    %cst_78 = arith.constant dense<0.000000e+00> : vector<4x8x8xf32>
    %212 = tpu.matmul %193, %202, %cst_78 {dimension_numbers = #tpu.dot_dimension_numbers<[2], [2], [1], [1], [0, 0, 0, 1, 1, 1], [0], [0]>} : vector<4x8x8xf32>, vector<4x8x8xf32>, vector<4x8x8xf32> -> vector<4x8x8xf32>
    "tpu.trace_stop"() : () -> ()
    %cst_79 = arith.constant 0.353553385 : f32
    %213 = vector.broadcast %cst_79 : f32 to vector<4x8x8xf32>
    %214 = arith.mulf %212, %213 : vector<4x8x8xf32>
    %cst_80 = arith.constant -1.000000e+30 : f32
    %215 = vector.broadcast %cst_80 : f32 to vector<4x8x8xf32>
    %216 = arith.select %4, %214, %215 : vector<4x8x8xi1>, vector<4x8x8xf32>
    %cst_81 = arith.constant dense<0xFF800000> : vector<4x8xf32>
    %217 = vector.multi_reduction <maximumf>, %216, %cst_81 [2] : vector<4x8x8xf32> to vector<4x8xf32>
    %218 = vector.shape_cast %217 : vector<4x8xf32> to vector<4x8x1xf32>
    %219 = vector.broadcast %218 : vector<4x8x1xf32> to vector<4x8x8xf32>
    %220 = arith.subf %216, %219 : vector<4x8x8xf32>
    %221 = math.exp %220 : vector<4x8x8xf32>
    %cst_82 = arith.constant dense<0.000000e+00> : vector<4x8xf32>
    %222 = vector.multi_reduction <add>, %221, %cst_82 [2] : vector<4x8x8xf32> to vector<4x8xf32>
    %223 = vector.shape_cast %222 : vector<4x8xf32> to vector<4x8x1xf32>
    %224 = tpu.reciprocal %223 {approx = true} : vector<4x8x1xf32> -> vector<4x8x1xf32>
    %225 = vector.broadcast %224 : vector<4x8x1xf32> to vector<4x8x8xf32>
    %226 = arith.mulf %221, %225 : vector<4x8x8xf32>
    "tpu.trace_start"() <{level = 10 : i32, message = "hqk,hkd->hqd"}> : () -> ()
    %cst_83 = arith.constant dense<0.000000e+00> : vector<4x8x8xf32>
    %227 = tpu.matmul %226, %211, %cst_83 {dimension_numbers = #tpu.dot_dimension_numbers<[2], [1], [1], [2], [0, 0, 0, 1, 1, 2], [0], [0]>} : vector<4x8x8xf32>, vector<4x8x8xf32>, vector<4x8x8xf32> -> vector<4x8x8xf32>
    "tpu.trace_stop"() : () -> ()
    %228 = vector.extract_strided_slice %227 {offsets = [0, 0, 0], sizes = [1, 8, 8], strides = [1, 1, 1]} : vector<4x8x8xf32> to vector<1x8x8xf32>
    %229 = vector.shape_cast %228 : vector<1x8x8xf32> to vector<8x8xf32>
    %230 = vector.extract_strided_slice %227 {offsets = [1, 0, 0], sizes = [1, 8, 8], strides = [1, 1, 1]} : vector<4x8x8xf32> to vector<1x8x8xf32>
    %231 = vector.shape_cast %230 : vector<1x8x8xf32> to vector<8x8xf32>
    %232 = vector.extract_strided_slice %227 {offsets = [2, 0, 0], sizes = [1, 8, 8], strides = [1, 1, 1]} : vector<4x8x8xf32> to vector<1x8x8xf32>
    %233 = vector.shape_cast %232 : vector<1x8x8xf32> to vector<8x8xf32>
    %234 = vector.extract_strided_slice %227 {offsets = [3, 0, 0], sizes = [1, 8, 8], strides = [1, 1, 1]} : vector<4x8x8xf32> to vector<1x8x8xf32>
    %235 = vector.shape_cast %234 : vector<1x8x8xf32> to vector<8x8xf32>
    %236 = tpu.concatenate %229, %231, %233, %235 in 1 : vector<8x8xf32>, vector<8x8xf32>, vector<8x8xf32>, vector<8x8xf32> -> vector<8x32xf32>
    %c1_84 = arith.constant 1 : index
    %c0_85 = arith.constant 0 : index
    %c0_86 = arith.constant 0 : index
    %237 = vector.load %arg6[%c1_84, %c0_85, %c0_86] : memref<2x32x32xf32, #tpu.memory_space<vmem>>, vector<1x32x32xf32>
    %238 = vector.shape_cast %237 : vector<1x32x32xf32> to vector<32x32xf32>
    %cst_87 = arith.constant dense<0.000000e+00> : vector<8x32xf32>
    %239 = tpu.matmul %236, %238, %cst_87 {dimension_numbers = #tpu.dot_dimension_numbers<[1], [0], [0], [1], [0, 0, 1, 1], [], []>} : vector<8x32xf32>, vector<32x32xf32>, vector<8x32xf32> -> vector<8x32xf32>
    %c1_88 = arith.constant 1 : index
    %c0_89 = arith.constant 0 : index
    %c0_90 = arith.constant 0 : index
    %240 = vector.load %arg7[%c1_88, %c0_89, %c0_90] : memref<2x1x32xf32, #tpu.memory_space<vmem>>, vector<1x1x32xf32>
    %241 = vector.shape_cast %240 : vector<1x1x32xf32> to vector<1x32xf32>
    %242 = vector.broadcast %241 : vector<1x32xf32> to vector<8x32xf32>
    %243 = arith.addf %239, %242 : vector<8x32xf32>
    %244 = arith.addf %150, %243 : vector<8x32xf32>
    %c1_91 = arith.constant 1 : index
    %c0_92 = arith.constant 0 : index
    %c0_93 = arith.constant 0 : index
    %245 = vector.load %arg8[%c1_91, %c0_92, %c0_93] : memref<2x1x32xf32, #tpu.memory_space<vmem>>, vector<1x1x32xf32>
    %246 = vector.shape_cast %245 : vector<1x1x32xf32> to vector<1x32xf32>
    %c1_94 = arith.constant 1 : index
    %c0_95 = arith.constant 0 : index
    %c0_96 = arith.constant 0 : index
    %247 = vector.load %arg9[%c1_94, %c0_95, %c0_96] : memref<2x1x32xf32, #tpu.memory_space<vmem>>, vector<1x1x32xf32>
    %248 = vector.shape_cast %247 : vector<1x1x32xf32> to vector<1x32xf32>
    %cst_97 = arith.constant dense<0.000000e+00> : vector<8xf32>
    %249 = vector.multi_reduction <add>, %244, %cst_97 [1] : vector<8x32xf32> to vector<8xf32>
    %250 = vector.shape_cast %249 : vector<8xf32> to vector<8x1xf32>
    %cst_98 = arith.constant 3.200000e+01 : f32
    %251 = vector.broadcast %cst_98 : f32 to vector<8x1xf32>
    %252 = arith.divf %250, %251 : vector<8x1xf32>
    %253 = vector.broadcast %252 : vector<8x1xf32> to vector<8x32xf32>
    %254 = arith.subf %244, %253 : vector<8x32xf32>
    %255 = arith.mulf %254, %254 : vector<8x32xf32>
    %cst_99 = arith.constant dense<0.000000e+00> : vector<8xf32>
    %256 = vector.multi_reduction <add>, %255, %cst_99 [1] : vector<8x32xf32> to vector<8xf32>
    %257 = vector.shape_cast %256 : vector<8xf32> to vector<8x1xf32>
    %cst_100 = arith.constant 3.200000e+01 : f32
    %258 = vector.broadcast %cst_100 : f32 to vector<8x1xf32>
    %259 = arith.divf %257, %258 : vector<8x1xf32>
    %cst_101 = arith.constant 9.99999974E-6 : f32
    %260 = vector.broadcast %cst_101 : f32 to vector<8x1xf32>
    %261 = arith.addf %259, %260 : vector<8x1xf32>
    %262 = math.rsqrt %261 : vector<8x1xf32>
    %263 = vector.broadcast %262 : vector<8x1xf32> to vector<8x32xf32>
    %264 = arith.mulf %254, %263 : vector<8x32xf32>
    %265 = vector.broadcast %246 : vector<1x32xf32> to vector<8x32xf32>
    %266 = arith.mulf %264, %265 : vector<8x32xf32>
    %267 = vector.broadcast %248 : vector<1x32xf32> to vector<8x32xf32>
    %268 = arith.addf %266, %267 : vector<8x32xf32>
    %c1_102 = arith.constant 1 : index
    %c0_103 = arith.constant 0 : index
    %c0_104 = arith.constant 0 : index
    %269 = vector.load %arg10[%c1_102, %c0_103, %c0_104] : memref<2x32x64xf32, #tpu.memory_space<vmem>>, vector<1x32x64xf32>
    %270 = vector.shape_cast %269 : vector<1x32x64xf32> to vector<32x64xf32>
    %cst_105 = arith.constant dense<0.000000e+00> : vector<8x64xf32>
    %271 = tpu.matmul %268, %270, %cst_105 {dimension_numbers = #tpu.dot_dimension_numbers<[1], [0], [0], [1], [0, 0, 1, 1], [], []>} : vector<8x32xf32>, vector<32x64xf32>, vector<8x64xf32> -> vector<8x64xf32>
    %c1_106 = arith.constant 1 : index
    %c0_107 = arith.constant 0 : index
    %c0_108 = arith.constant 0 : index
    %272 = vector.load %arg11[%c1_106, %c0_107, %c0_108] : memref<2x1x64xf32, #tpu.memory_space<vmem>>, vector<1x1x64xf32>
    %273 = vector.shape_cast %272 : vector<1x1x64xf32> to vector<1x64xf32>
    %274 = vector.broadcast %273 : vector<1x64xf32> to vector<8x64xf32>
    %275 = arith.addf %271, %274 : vector<8x64xf32>
    %276 = arith.mulf %275, %275 : vector<8x64xf32>
    %277 = arith.mulf %275, %276 : vector<8x64xf32>
    %cst_109 = arith.constant 4.471500e-02 : f32
    %278 = vector.broadcast %cst_109 : f32 to vector<8x64xf32>
    %279 = arith.mulf %278, %277 : vector<8x64xf32>
    %280 = arith.addf %275, %279 : vector<8x64xf32>
    %cst_110 = arith.constant 0.797884583 : f32
    %281 = vector.broadcast %cst_110 : f32 to vector<8x64xf32>
    %282 = arith.mulf %281, %280 : vector<8x64xf32>
    %283 = math.tanh %282 : vector<8x64xf32>
    %cst_111 = arith.constant 1.000000e+00 : f32
    %284 = vector.broadcast %cst_111 : f32 to vector<8x64xf32>
    %285 = arith.addf %284, %283 : vector<8x64xf32>
    %cst_112 = arith.constant 5.000000e-01 : f32
    %286 = vector.broadcast %cst_112 : f32 to vector<8x64xf32>
    %287 = arith.mulf %286, %285 : vector<8x64xf32>
    %288 = arith.mulf %275, %287 : vector<8x64xf32>
    %c1_113 = arith.constant 1 : index
    %c0_114 = arith.constant 0 : index
    %c0_115 = arith.constant 0 : index
    %289 = vector.load %arg12[%c1_113, %c0_114, %c0_115] : memref<2x64x32xf32, #tpu.memory_space<vmem>>, vector<1x64x32xf32>
    %290 = vector.shape_cast %289 : vector<1x64x32xf32> to vector<64x32xf32>
    %cst_116 = arith.constant dense<0.000000e+00> : vector<8x32xf32>
    %291 = tpu.matmul %288, %290, %cst_116 {dimension_numbers = #tpu.dot_dimension_numbers<[1], [0], [0], [1], [0, 0, 1, 1], [], []>} : vector<8x64xf32>, vector<64x32xf32>, vector<8x32xf32> -> vector<8x32xf32>
    %c1_117 = arith.constant 1 : index
    %c0_118 = arith.constant 0 : index
    %c0_119 = arith.constant 0 : index
    %292 = vector.load %arg13[%c1_117, %c0_118, %c0_119] : memref<2x1x32xf32, #tpu.memory_space<vmem>>, vector<1x1x32xf32>
    %293 = vector.shape_cast %292 : vector<1x1x32xf32> to vector<1x32xf32>
    %294 = vector.broadcast %293 : vector<1x32xf32> to vector<8x32xf32>
    %295 = arith.addf %291, %294 : vector<8x32xf32>
    %296 = arith.addf %244, %295 : vector<8x32xf32>
    %297 = tpu.concatenate %90, %150, %236, %296 in 1 : vector<8x32xf32>, vector<8x32xf32>, vector<8x32xf32>, vector<8x32xf32> -> vector<8x128xf32>
    %c0_120 = arith.constant 0 : index
    %c0_121 = arith.constant 0 : index
    %c0_122 = arith.constant 0 : index
    %298 = vector.load %arg14[%c0_120, %c0_121, %c0_122] : memref<1x8x128xf32, #tpu.memory_space<vmem>>, vector<1x8x128xf32>
    %299 = vector.shape_cast %298 : vector<1x8x128xf32> to vector<8x128xf32>
    %300 = vector.shape_cast %297 : vector<8x128xf32> to vector<1x8x128xf32>
    tpu.vector_store %arg14[%c0_120, %c0_121, %c0_122], %300 {strides = array<i32>} : memref<1x8x128xf32, #tpu.memory_space<vmem>>, vector<1x8x128xf32>,
    return
  }
  func.func @transform_0(%arg0: i32) -> (i32, i32, i32) {
    %c0_i32 = arith.constant 0 : i32
    %c0_i32_0 = arith.constant 0 : i32
    %c0_i32_1 = arith.constant 0 : i32
    return %arg0, %c0_i32, %c0_i32_0 : i32, i32, i32
  }
  func.func @transform_1(%arg0: i32) -> (i32, i32, i32) {
    %c0_i32 = arith.constant 0 : i32
    %c0_i32_0 = arith.constant 0 : i32
    %c0_i32_1 = arith.constant 0 : i32
    %c0_i32_2 = arith.constant 0 : i32
    return %c0_i32, %c0_i32_0, %c0_i32_1 : i32, i32, i32
  }
  func.func @transform_2(%arg0: i32) -> (i32, i32, i32) {
    %c0_i32 = arith.constant 0 : i32
    %c0_i32_0 = arith.constant 0 : i32
    %c0_i32_1 = arith.constant 0 : i32
    %c0_i32_2 = arith.constant 0 : i32
    return %c0_i32, %c0_i32_0, %c0_i32_1 : i32, i32, i32
  }
  func.func @transform_3(%arg0: i32) -> (i32, i32, i32) {
    %c0_i32 = arith.constant 0 : i32
    %c0_i32_0 = arith.constant 0 : i32
    %c0_i32_1 = arith.constant 0 : i32
    %c0_i32_2 = arith.constant 0 : i32
    return %c0_i32, %c0_i32_0, %c0_i32_1 : i32, i32, i32
  }
  func.func @transform_4(%arg0: i32) -> (i32, i32, i32) {
    %c0_i32 = arith.constant 0 : i32
    %c0_i32_0 = arith.constant 0 : i32
    %c0_i32_1 = arith.constant 0 : i32
    %c0_i32_2 = arith.constant 0 : i32
    return %c0_i32, %c0_i32_0, %c0_i32_1 : i32, i32, i32
  }
  func.func @transform_5(%arg0: i32) -> (i32, i32, i32) {
    %c0_i32 = arith.constant 0 : i32
    %c0_i32_0 = arith.constant 0 : i32
    %c0_i32_1 = arith.constant 0 : i32
    %c0_i32_2 = arith.constant 0 : i32
    return %c0_i32, %c0_i32_0, %c0_i32_1 : i32, i32, i32
  }
  func.func @transform_6(%arg0: i32) -> (i32, i32, i32) {
    %c0_i32 = arith.constant 0 : i32
    %c0_i32_0 = arith.constant 0 : i32
    %c0_i32_1 = arith.constant 0 : i32
    %c0_i32_2 = arith.constant 0 : i32
    return %c0_i32, %c0_i32_0, %c0_i32_1 : i32, i32, i32
  }
  func.func @transform_7(%arg0: i32) -> (i32, i32, i32) {
    %c0_i32 = arith.constant 0 : i32
    %c0_i32_0 = arith.constant 0 : i32
    %c0_i32_1 = arith.constant 0 : i32
    %c0_i32_2 = arith.constant 0 : i32
    return %c0_i32, %c0_i32_0, %c0_i32_1 : i32, i32, i32
  }
  func.func @transform_8(%arg0: i32) -> (i32, i32, i32) {
    %c0_i32 = arith.constant 0 : i32
    %c0_i32_0 = arith.constant 0 : i32
    %c0_i32_1 = arith.constant 0 : i32
    %c0_i32_2 = arith.constant 0 : i32
    return %c0_i32, %c0_i32_0, %c0_i32_1 : i32, i32, i32
  }
  func.func @transform_9(%arg0: i32) -> (i32, i32, i32) {
    %c0_i32 = arith.constant 0 : i32
    %c0_i32_0 = arith.constant 0 : i32
    %c0_i32_1 = arith.constant 0 : i32
    %c0_i32_2 = arith.constant 0 : i32
    return %c0_i32, %c0_i32_0, %c0_i32_1 : i32, i32, i32
  }
  func.func @transform_10(%arg0: i32) -> (i32, i32, i32) {
    %c0_i32 = arith.constant 0 : i32
    %c0_i32_0 = arith.constant 0 : i32
    %c0_i32_1 = arith.constant 0 : i32
    %c0_i32_2 = arith.constant 0 : i32
    return %c0_i32, %c0_i32_0, %c0_i32_1 : i32, i32, i32
  }
  func.func @transform_11(%arg0: i32) -> (i32, i32, i32) {
    %c0_i32 = arith.constant 0 : i32
    %c0_i32_0 = arith.constant 0 : i32
    %c0_i32_1 = arith.constant 0 : i32
    %c0_i32_2 = arith.constant 0 : i32
    return %c0_i32, %c0_i32_0, %c0_i32_1 : i32, i32, i32
  }
  func.func @transform_12(%arg0: i32) -> (i32, i32, i32) {
    %c0_i32 = arith.constant 0 : i32
    %c0_i32_0 = arith.constant 0 : i32
    %c0_i32_1 = arith.constant 0 : i32
    %c0_i32_2 = arith.constant 0 : i32
    return %c0_i32, %c0_i32_0, %c0_i32_1 : i32, i32, i32
  }
  func.func @transform_13(%arg0: i32) -> (i32, i32, i32) {
    %c0_i32 = arith.constant 0 : i32
    %c0_i32_0 = arith.constant 0 : i32
    %c0_i32_1 = arith.constant 0 : i32
    return %arg0, %c0_i32, %c0_i32_0 : i32, i32, i32
  }
}

</mosaic_0001>

<bundles_post_ra>
// kernel: tpu_custom_call.1
= control target key start
LH: loop header
LB: loop body
LE: loop exit
PB: predicated region body
PF: predicated region fallthrough
CT: control target
= control target key end

     0   :  { %s2726_s0 = inlined_call_operand.hbm [shape: f32[2,8,32], index: 0, kind: input, shape index: {}]   ;;  %s2727_s1 = inlined_call_operand.hbm [shape: f32[2,1,32], index: 1, kind: input, shape index: {}]   ;;  %s2728_s2 = inlined_call_operand.hbm [shape: f32[2,1,32], index: 2, kind: input, shape index: {}]   ;;  %s2729_s3 = inlined_call_operand.vmem [shape: f32[2,32,96], index: 3, kind: input, shape index: {}]   ;;  %s2730_s4 = inlined_call_operand.vmem [shape: f32[2,1,96], index: 4, kind: input, shape index: {}]   ;;  %s2731_s5 = inlined_call_operand.vmem [shape: f32[2,32,32], index: 5, kind: input, shape index: {}]   ;;  %s2732_s6 = inlined_call_operand.vmem [shape: f32[2,1,32], index: 6, kind: input, shape index: {}]   ;;  %s2733_s7 = inlined_call_operand.hbm [shape: f32[2,1,32], index: 7, kind: input, shape index: {}]   ;;  %s2734_s8 = inlined_call_operand.hbm [shape: f32[2,1,32], index: 8, kind: input, shape index: {}]   ;;  %s2735_s9 = inlined_call_operand.vmem [shape: f32[2,32,64], index: 9, kind: input, shape index: {}]   ;;  %s2736_s10 = inlined_call_operand.vmem [shape: f32[2,1,64], index: 10, kind: input, shape index: {}]   ;;  %s2737_s11 = inlined_call_operand.vmem [shape: f32[2,64,32], index: 11, kind: input, shape index: {}]   ;;  %s2738_s12 = inlined_call_operand.vmem [shape: f32[2,1,32], index: 12, kind: input, shape index: {}]   ;;  %s2739_s13 = inlined_call_operand.hbm [shape: f32[2,8,128], index: 13, kind: output, shape index: {}]  }
   0x1   :  { %2748 = sst [smem:[#allocation20_spill]] %s2727_s1 }
   0x2   :  { %2749 = sst [smem:[#allocation21_spill]] %s2728_s2 }
   0x3   :  { %2750 = sst [smem:[#allocation22_spill]] %s2733_s7 }
   0x4   :  { %2751 = sst [smem:[#allocation23_spill]] %s2734_s8 }
   0x5   :  { %18 = vsyncpa [#allocation3], 0 }
   0x6   :  { %20 = vsyncpa [#allocation3 + $0x1], 0 }
   0x7   :  { %21 = vsyncpa [#allocation6], 0 }
   0x8   :  { %22 = vsyncpa [#allocation9], 0 }
   0x9   :  { %23 = vsyncpa [#allocation4], 0 }
   0xa   :  { %25 = vsyncpa [#allocation4 + $0x1], 0  ;;  %s2223_s25 = smov 0   ;;  %s2225_s26 = smov 0  }
   0xb   :  { %s2227_s27 = smov 0   ;;  %s2229_s28 = smov 0  }
   0xc LB: > { %2752 = sst [smem:[#allocation16_spill]] %s2131_s27  ;;  %s2247_s15 = sadd.s32 4294967295, %s2135_s28   ;;  %s2135_s28 = sphi %s2229_s28, %s2775_s28   ;;  %s2131_s27 = sphi %s2227_s27, %s2777_s27   ;;  %s2127_s26 = sphi %s2225_s26, %s2779_s26   ;;  %s2123_s25 = sphi %s2223_s25, %s2778_s25  }
   0xd   : > { %s2753_s1 = sld [smem:[#allocation20_spill]]  ;;  %p1665_p0 = scmp.ge.s32.totalorder %s2135_s28, 1 }
   0xe   : > { %p52_p1 = scmp.eq.s32.totalorder %s2247_s15, 0  ;;  %p340_p2 = scmp.lt.s32.totalorder %s2135_s28, 3 }
   0xf   : > { %s2137_s17 = smov [#allocation5]   ;;  %s2755_s7 = sld [smem:[#allocation22_spill]] }
  0x10   : > { %p2252_p3 = pnand %p1665_p0, %p340_p2  ;;  %s353_s18 = sshll.u32 %s2137_s17, 4  ;;  %s354_s18 = int_to_ptr.vmem [resolvable:$true] %s353_s18 }
  0x11   : > { %s2757_s2 = sld [smem:[#allocation21_spill]]  ;;  %s2138_s30 = smov [#allocation8]  }
  0x12   : > { %p1760_p4 = pneg %p2252_p3  ;;  %s393_s17 = sshll.u32 %s2138_s30, 4  ;;  %s394_s17 = int_to_ptr.vmem [resolvable:$true] %s393_s17 }
  0x13   : > { %s351_s14 = sshll.u32 %s2753_s1, 4  ;;  %s2139_s1 = smov 16   ;;  %s352_s14 = int_to_ptr.hbm [resolvable:$true] %s351_s14 }
  0x14   : > { %p2264_p6 = pnand %p1760_p4, %p52_p1  ;;  %s2140_s19 = smov 1  }
  0x15   : > { %s391_s21 = sshll.u32 %s2755_s7, 4  ;;  %s2758_s8 = sld [smem:[#allocation23_spill]]  ;;  %s392_s21 = int_to_ptr.hbm [resolvable:$true] %s391_s21 }
  0x16   : > { %1763 = dma.hbm_to_vmem [thread:$0]  (!%p2264_p6), %s352_s14, 32, %s354_s18, [#allocation6], %s2139_s1, %s2139_s1, %s2140_s19  }
  0x17   : > { %s365_s29 = sshll.u32 %s2757_s2, 4  ;;  %s2141_s24 = smov [#allocation7]   ;;  %s366_s29 = int_to_ptr.hbm [resolvable:$true] %s365_s29 }
  0x18   : > { %1769 = dma.hbm_to_vmem [thread:$0]  (!%p2264_p6), %s392_s21, 32, %s394_s17, [#allocation9], %s2139_s1, %s2139_s1, %s2140_s19  }
  0x19   : > { %s367_s30 = sshll.u32 %s2141_s24, 4  ;;  %s2142_s14 = smov [#allocation10]   ;;  %s368_s30 = int_to_ptr.vmem [resolvable:$true] %s367_s30 }
  0x1a   : > { %1766 = dma.hbm_to_vmem [thread:$0]  (!%p2264_p6), %s366_s29, 32, %s368_s30, [#allocation6], %s2139_s1, %s2139_s1, %s2140_s19  }
  0x1b   : > { %s405_s23 = sshll.u32 %s2758_s8, 4  ;;  %s407_s18 = sshll.u32 %s2142_s14, 4  ;;  %s406_s23 = int_to_ptr.hbm [resolvable:$true] %s405_s23  ;;  %s408_s18 = int_to_ptr.vmem [resolvable:$true] %s407_s18 }
  0x1c   : > { %1772 = dma.hbm_to_vmem [thread:$0]  (!%p2264_p6), %s406_s23, 32, %s408_s18, [#allocation9], %s2139_s1, %s2139_s1, %s2140_s19  }
  0x1d   : > { %s1664_s7 = sadd.s32 4294967294, %s2135_s28   ;;  %s2284_s21 = sadd.s32 1, %s2135_s28  }
  0x1e   : > { %2759 = sst [smem:[#allocation17_spill]] %s2284_s21  ;;  %s35_s17 = ssub.s32 %s2135_s28, %s2284_s21 }
  0x1f   : > { %s38_s20 = sadd.s32 1, %s2131_s27  ;;  %p36_p7 = scmp.eq.s32.totalorder %s35_s17, 0 }
  0x20   : > { %p45_p8 = scmp.ne.s32.totalorder %s2131_s27, %s2127_s26  ;;  %p46_p9 = scmp.eq.s32.totalorder %s2135_s28, 0 }
  0x21   : > { %p51_p10 = scmp.ne.s32.totalorder %s2127_s26, %s2123_s25  ;;  %p327_p13 = scmp.eq.s32.totalorder %s2247_s15, 1 }
  0x22   : > { %s2295_s29 = scalar_select %p36_p7, %s2131_s27, %s38_s20  }
  0x23   : > { %p2297_p11 = por %p46_p9, %p45_p8  ;;  %p2303_p12 = por %p52_p1, %p51_p10 }
  0x24   : > { %2760 = sst [smem:[#allocation18_spill]] %s2295_s29  ;;  %p333_p0 = scmp.eq.s32.totalorder %s1664_s7, 1 }
  0x25   : > { %p1785_p2 = scmp.lt.s32.totalorder %s2135_s28, 2  ;;  %s433_s22 = sand.u32 1, %s2131_s27  }
  0x26   : > { %p2310_p4 = por %p327_p13, %p45_p8  ;;  %p2314_p6 = por %p333_p0, %p51_p10 }
  0x27   : > { %s1671_s30 = sshll.u32 %s433_s22, 3  ;;  %s1672_s14 = sshll.u32 %s2135_s28, 3 }
  0x28   : > { %s2764_s23 = scalar_select %p2314_p6, 1, 0 }
  0x29   : > { %s441_s20 = scalar_lea.hbm %s2726_s0, %s1672_s14  ;;  %s437_s2 = scalar_lea.vmem [#allocation2], %s1671_s30 }
  0x2a   : > { %2765 = sst [smem:[#allocation19_spill]] %s2764_s23  ;;  %s445_s8 = sshll.u32 %s437_s2, 4  ;;  %s446_s8 = int_to_ptr.vmem [resolvable:$true] %s445_s8 }
  0x2b   : > { %s443_s29 = sshll.u32 %s441_s20, 4  ;;  %p2324_p7 = pnand %p1785_p2, %p2297_p11  ;;  %s444_s29 = int_to_ptr.hbm [resolvable:$true] %s443_s29 }
  0x2c   : > { %s434_s27 = scalar_lea.sflag [#allocation3], %s433_s22  ;;  %s2031_s21 = sshra.s32 %s444_s29, 4  ;;  %s2032_s21 = int_to_ptr.hbm [resolvable:$true] %s2031_s21 }
  0x2d   : > { %s2033_s23 = scalar_lea.hbm %s2032_s21, 8  ;;  %p2035_p9 = pneg %p2324_p7 }
  0x2e   : > { %p2034_p8 = scmp.ne.s32.totalorder %s2032_s21, %s2033_s23  ;;  %s2038_s14 = scalar_lea.hbm %s2726_s0, 16 }
  0x2f   : > { %p2039_p11 = scmp.lt.s32.totalorder %s2032_s21, %s2726_s0  ;;  %p2040_p0 = scmp.lt.s32.totalorder %s2038_s14, %s2033_s23 }
  0x30   : > { %p2036_p10 = pnand %p2035_p9, %p2034_p8 }
  0x31   : > { %p2041_p2 = por %p2040_p0, %p2039_p11 }
  0x32   : > { %p2037_p13 = pneg %p2036_p10 }
  0x34   : > { %p2042_p5 = pnand %p2041_p2, %p2037_p13 }
  0x36   : > { %2045 = shalt.err (!%p2042_p5)
}
  0x37   : > { %1776 = dma.hbm_to_vmem [thread:$0]  (!%p2324_p7), %s444_s29, 128, %s446_s8, %s434_s27  }
  0x38   : > { %454 = sbr.rel (%p2252_p3) target bundleno = 4118 (0x1016), region = 72  ;;  %s2341_s22 = sand.u32 (!%p2252_p3), 1, %s2127_s26  }
  0x39   : > { %s2744_s17 = sshll.u32 (!%p2252_p3), %s2341_s22, 3  ;;  %s457_s20 = scalar_lea.sflag (!%p2252_p3), [#allocation3], %s2341_s22 }
  0x3a   : > { %s460_s21 = scalar_lea.vmem (!%p2252_p3), [#allocation2], %s2744_s17 }
  0x3d   : > { %2106 = dma.done.wait (%p2303_p12), %s457_s20, 128  }
  0x3e   : > { %2108 = vsyncadd (%p2303_p12), %s457_s20, 4294967168 }
  0x3f   : > { %2110 = dma.done.wait (%p52_p1), [#allocation6], 64  }
  0x40   : > { %2112 = vsyncadd (%p52_p1), [#allocation6], 4294967232 }
  0x41   : > { %2114 = dma.done.wait (%p52_p1), [#allocation9], 64  }
  0x42   : > { %2116 = vsyncadd (%p52_p1), [#allocation9], 4294967232  ;;  %vm532_vm0 = vcmask 261120   ;;  %v2359_v0 = vld [vmem:[%s460_s21] sm:$0xff]  ;;  %v2143_v2 = vmov 32.0   ;;  %v573_v14 = vld [vmem:[%s2729_s3 + $0x18] sm:$0xff]  ;;  %v525_v43 = vlaneseq }
  0x43   : > { %v533_v1 = vsel %vm532_vm0, %v2359_v0, 0.0  ;;  %1865 = vrcp.f32 %v2143_v2  ;;  %593 = vmatpush.msra.mxu0 %v573_v14  ;;  %v572_v15 = vld [vmem:[%s2729_s3 + $0x10] sm:$0xff]  ;;  %v571_v16 = vld [vmem:[%s2729_s3 + $0x8] sm:$0xff]  ;;  %v570_v17 = vld [vmem:[%s2729_s3] sm:$0xff]  ;;  %s2144_s18 = smov 104   ;;  %s2145_s24 = smov 120  }
  0x44   : > { %534 = vadd.xlane.f32.xlu0 %v533_v1  ;;  %v1849_v27 = vld [vmem:[#allocation5] ss:$0 sm:$0xff]  ;;  %v1850_v30 = vld [vmem:[#allocation7] ss:$0 sm:$0xff]  ;;  %v1851_v33 = vld [vmem:[%s2730_s4] ss:$0 sm:$0xff] }
  0x45   : > { %594 = vmatpush.msra.mxu0 %v572_v15  ;;  %s2146_s20 = smov 96   ;;  %s2147_s21 = smov 112   ;;  %vm610_vm5 = vcmask 64512   ;;  %v526_v44 = vshrl.u32 %v525_v43, 7  ;;  %v528_v45 = vand.u32 127, %v525_v43  ;;  %v888_v43 = vld [vmem:[%s2731_s5 + $0x10] sm:$0xff] }
  0x46   : > { %s2148_s8 = smov 64   ;;  %s2745_s27 = smov 8   ;;  %vm882_vm7 = vcmask 130048   ;;  %vm884_vm8 = vcmask 195584   ;;  %vm1002_vm12 = vcmask 523264  }
  0x47   : > { %595 = vmatpush.msra.mxu0 %v571_v16  ;;  %vm2415_vm6 = vcmp.ge.s32.totalorder %v526_v44, %v528_v45  ;;  %s2747_s16 = smov 16   ;;  %s2746_s29 = smov 24   ;;  %v887_v44 = vld [vmem:[%s2731_s5 + $0x8] sm:$0xff]  ;;  %v886_v45 = vld [vmem:[%s2731_s5] sm:$0xff] }
  0x48   : > { %s2772_s23 = sshll.u32 %s2341_s22, 3 }
  0x49   : > { %v1866_v3 = vpop.eup %1865  ;;  %596 = vmatpush.msra.mxu0 %v570_v17  ;;  %s523_s7 = scalar_lea.vmem [#allocation11], %s2772_s23 }
  0x4a   : > { %v537_v4 = vmul.f32 32.0, %v1866_v3  ;;  %vm541_vm1 = vweird.f32 %v1866_v3  ;;  %s1553_s30 = sshll.u32 %s523_s7, 4  ;;  %s1554_s30 = int_to_ptr.vmem [resolvable:$true] %s1553_s30 }
  0x4c   : > { %v538_v5 = vsub.f32 1.0, %v537_v4 }
  0x4e   : > { %v539_v6 = vmul.f32 %v1866_v3, %v538_v5 }
  0x50   : > { %v540_v7 = vadd.f32 %v1866_v3, %v539_v6 }
  0x52   : > { %v2363_v8 = vsel %vm541_vm1, %v1866_v3, %v540_v7 }
  0xb7   : > { %v535_v9 = vpop.xlane.xlu0 %534 }
  0xb8   : > { %v543_v10 = vmul.f32 %v2363_v8, %v535_v9 }
  0xba   : > { %v544_v11 = vsub.f32 %v2359_v0, %v543_v10 }
  0xbc   : > { %v545_v12 = vmul.f32 %v544_v11, %v544_v11 }
  0xbe   : > { %v546_v13 = vsel %vm532_vm0, %v545_v12, 0.0 }
  0xbf   : > { %547 = vadd.xlane.f32.xlu0 %v546_v13 }
 0x132   : > { %v548_v18 = vpop.xlane.xlu0 %547 }
 0x133   : > { %v549_v19 = vmul.f32 %v548_v18, %v2363_v8 }
 0x135   : > { %v550_v20 = vadd.f32 1e-05, %v549_v19 }
 0x137   : > { %1867 = vrsqrt.f32 %v550_v20  ;;  %vm557_vm3 = vweird.f32 %v550_v20 }
 0x13d   : > { %v1868_v21 = vpop.eup %1867 }
 0x13e   : > { %v552_v22 = vmul.f32 %v1868_v21, %v550_v20  ;;  %vm558_vm2 = vweird.f32 %v1868_v21 }
 0x13f   : > { %vm559_vm4 = vmor %vm557_vm3, %vm558_vm2 }
 0x140   : > { %v553_v23 = vmul.f32 %v1868_v21, %v552_v22 }
 0x142   : > { %v554_v24 = vmul.f32 0.5, %v553_v23 }
 0x144   : > { %v555_v25 = vsub.f32 1.5, %v554_v24 }
 0x146   : > { %v556_v26 = vmul.f32 %v1868_v21, %v555_v25 }
 0x148   : > { %v560_v28 = vsel %vm559_vm4, %v1868_v21, %v556_v26  ;;  %vm1537_vm4 = vcmask 785408  }
 0x149   : > { %v561_v29 = vmul.f32 %v560_v28, %v544_v11 }
 0x14b   : > { %v565_v31 = vmul.f32 %v1849_v27, %v561_v29 }
 0x14d   : > { %v569_v32 = vadd.f32 %v1850_v30, %v565_v31 }
 0x14f   : > { %1680 = vmatmul.msk.f32.vlgmr.msra.gmra.mxu0 %vm532_vm0, %v569_v32 }
 0x1cc   : > { %v598_v34 = vpop.f32.mrf.mxu0 }
 0x1cd   : > { %v2385_v35 = vadd.f32 %v1851_v33, %v598_v34 }
 0x1cf   : > { %606 = vrot.lane.b32.xlu2 %v2385_v35, %s2144_s18  ;;  %602 = vrot.lane.b32.xlu1 %v2385_v35, %s2145_s24 }
 0x1d7   : > { %608 = vrot.lane.b32.xlu2 %v2385_v35, %s2146_s20  ;;  %604 = vrot.lane.b32.xlu1 %v2385_v35, %s2147_s21 }
 0x229   : > { %v2395_v36 = vpop.permute.xlu2 %606 }
 0x22a   : > { %687 = vrot.lane.b32.xlu2 %v2395_v36, %s2146_s20 }
 0x231   : > { %v609_v37 = vpop.permute.xlu2 %608 }
 0x232   : > { %1681 = vmatpush.xpose.msk.msra.mxu2 %vm610_vm5, %v609_v37 }
 0x235   : > { %1682 = vmatmul.msk.f32.vlgmr.msra.gmra.mxu2 %vm610_vm5, %v2385_v35 }
 0x241   : > { %v603_v38 = vpop.permute.xlu1 %602 }
 0x242   : > { %635 = vrot.lane.b32.xlu0 %v603_v38, %s2146_s20 }
 0x249   : > { %v2403_v39 = vpop.permute.xlu1 %604 }
 0x24a   : > { %661 = vrot.lane.b32.xlu1 %v2403_v39, %s2146_s20  ;;  %v1839_v22 = vpack.i.bf16 %v2395_v36, %v2403_v39 }
 0x284   : > { %v688_v40 = vpop.permute.xlu2 %687 }
 0x285   : > { %1687 = vmatpush.xpose.msk.msra.mxu1 %vm610_vm5, %v688_v40 }
 0x288   : > { %1688 = vmatmul.msk.f32.vlgmr.msra.gmra.mxu1 %vm610_vm5, %v2395_v36 }
 0x2b4   : > { %v636_v41 = vpop.permute.xlu0 %635 }
 0x2b5   : > { %1683 = vmatpush.xpose.msk.msrb.mxu2 %vm610_vm5, %v636_v41 }
 0x2b8   : > { %1684 = vmatmul.msk.f32.vlgmr.msrb.gmra.mxu2 %vm610_vm5, %v603_v38  ;;  %v632_v51 = vpop.f32.mrf.mxu2 }
 0x2b9   : > { %v713_v60 = vmul.f32 0.35355338, %v632_v51 }
 0x2bb   : > { %v717_v61 = vsel %vm2415_vm6, %v713_v60, -1e+30 }
 0x2bc   : > { %v662_v42 = vpop.permute.xlu1 %661  ;;  %v721_v62 = vsel %vm610_vm5, %v717_v61, -inf }
 0x2bd   : > { %1685 = vmatpush.xpose.msk.msra.mxu3 %vm610_vm5, %v662_v42  ;;  %v889_v42 = vld [vmem:[%s2731_s5 + $0x18] sm:$0xff] }
 0x2c0   : > { %1686 = vmatmul.msk.f32.vlgmr.msra.gmra.mxu3 %vm610_vm5, %v2403_v39 }
 0x305   : > { %v710_v46 = vpop.f32.mrf.mxu1 }
 0x306   : > { %v716_v47 = vmul.f32 0.35355338, %v710_v46 }
 0x308   : > { %v720_v49 = vsel %vm2415_vm6, %v716_v47, -1e+30 }
 0x309   : > { %v730_v50 = vsel %vm610_vm5, %v720_v49, -inf }
 0x30a   : > { %731 = vmax.xlane.f32.xlu0 %v730_v50 }
 0x31e   : > { %791 = vrot.lane.b32.xlu0 %v603_v38, %s2148_s8 }
 0x33b   : > { %v658_v52 = vpop.f32.mrf.mxu2 }
 0x33c   : > { %v714_v53 = vmul.f32 0.35355338, %v658_v52 }
 0x33e   : > { %v718_v54 = vsel %vm2415_vm6, %v714_v53, -1e+30 }
 0x33f   : > { %v724_v55 = vsel %vm610_vm5, %v718_v54, -inf }
 0x340   : > { %725 = vmax.xlane.f32.xlu1 %v724_v55 }
 0x343   : > { %v684_v56 = vpop.f32.mrf.mxu3 }
 0x344   : > { %v715_v57 = vmul.f32 0.35355338, %v684_v56 }
 0x346   : > { %v719_v58 = vsel %vm2415_vm6, %v715_v57, -1e+30 }
 0x347   : > { %v727_v59 = vsel %vm610_vm5, %v719_v58, -inf }
 0x348   : > { %728 = vmax.xlane.f32.xlu2 %v727_v59 }
 0x350   : > { %722 = vmax.xlane.f32.xlu2 %v721_v62 }
 0x37d   : > { %v732_v63 = vpop.xlane.xlu0 %731 }
 0x37e   : > { %v736_v1 = vsub.f32 %v720_v49, %v732_v63 }
 0x380   : > { %v743_v2 = vmul.f32 1.442695, %v736_v1  ;;  %v953_v1 = vld [vmem:[%s2735_s9 + $0x18] sm:$0xff] }
 0x382   : > { %1869 = vpow2.f32 %v743_v2  ;;  %v951_v2 = vld [vmem:[%s2735_s9 + $0x8] sm:$0xff] }
 0x388   : > { %v1870_v3 = vpop.eup %1869 }
 0x389   : > { %v754_v4 = vsel %vm610_vm5, %v1870_v3, 0.0 }
 0x38a   : > { %755 = vadd.xlane.f32.xlu1 %v754_v4 }
 0x390   : > { %v792_v5 = vpop.permute.xlu0 %791 }
 0x391   : > { %812 = vmatpush.msrb.mxu3 %v792_v5 }
 0x393   : > { %973 = vmatpush.msra.mxu3 %v953_v1 }
 0x3b3   : > { %v726_v6 = vpop.xlane.xlu1 %725 }
 0x3b4   : > { %v734_v7 = vsub.f32 %v718_v54, %v726_v6  ;;  %v1852_v54 = vld [vmem:[%s2732_s6] ss:$0 sm:$0xff] }
 0x3b6   : > { %v739_v9 = vmul.f32 1.442695, %v734_v7 }
 0x3b8   : > { %1871 = vpow2.f32 %v739_v9 }
 0x3bb   : > { %v729_v10 = vpop.xlane.xlu2 %728 }
 0x3bc   : > { %v735_v11 = vsub.f32 %v719_v58, %v729_v10 }
 0x3be   : > { %v1872_v12 = vpop.eup %1871  ;;  %v741_v13 = vmul.f32 1.442695, %v735_v11 }
 0x3bf   : > { %v748_v14 = vsel %vm610_vm5, %v1872_v12, 0.0 }
 0x3c0   : > { %1873 = vpow2.f32 %v741_v13  ;;  %749 = vadd.xlane.f32.xlu1 %v748_v14  ;;  %v1853_v14 = vld [vmem:[#allocation8] ss:$0 sm:$0xff] }
 0x3c3   : > { %v723_v15 = vpop.xlane.xlu2 %722 }
 0x3c4   : > { %v733_v16 = vsub.f32 %v717_v61, %v723_v15 }
 0x3c6   : > { %v1874_v17 = vpop.eup %1873  ;;  %v737_v18 = vmul.f32 1.442695, %v733_v16 }
 0x3c7   : > { %v751_v19 = vsel %vm610_vm5, %v1874_v17, 0.0 }
 0x3c8   : > { %1875 = vpow2.f32 %v737_v18  ;;  %752 = vadd.xlane.f32.xlu2 %v751_v19 }
 0x3ce   : > { %v1876_v20 = vpop.eup %1875 }
 0x3cf   : > { %v745_v21 = vsel %vm610_vm5, %v1876_v20, 0.0 }
 0x3d0   : > { %746 = vadd.xlane.f32.xlu1 %v745_v21  ;;  %v996_v21 = vld [vmem:[%s2737_s11 + $0x30] sm:$0xff] }
 0x3e0   : > { %1840 = vrot.lane.b32.xlu2 %v1839_v22, %s2148_s8  ;;  %v995_v22 = vld [vmem:[%s2737_s11 + $0x28] sm:$0xff] }
 0x3e9   : > { %765 = vrot.lane.b32.xlu1 %v2385_v35, %s2148_s8 }
 0x3fd   : > { %v756_v23 = vpop.xlane.xlu1 %755 }
 0x433   : > { %v750_v24 = vpop.xlane.xlu1 %749 }
 0x434   : > { %1877 = vrcp.f32 %v750_v24  ;;  %v993_v24 = vld [vmem:[%s2737_s11 + $0x18] sm:$0xff] }
 0x435   : > { %1879 = vrcp.f32 %v756_v23  ;;  %v994_v23 = vld [vmem:[%s2737_s11 + $0x20] sm:$0xff] }
 0x43a   : > { %v1878_v25 = vpop.eup %1877 }
 0x43b   : > { %v753_v26 = vpop.xlane.xlu2 %752  ;;  %v762_v27 = vmul.f32 %v1878_v25, %v1872_v12  ;;  %v1880_v28 = vpop.eup %1879  ;;  %v992_v25 = vld [vmem:[%s2737_s11 + $0x10] sm:$0xff] }
 0x43c   : > { %1881 = vrcp.f32 %v753_v26  ;;  %v764_v34 = vmul.f32 %v1880_v28, %v1870_v3  ;;  %v950_v3 = vld [vmem:[%s2735_s9] sm:$0xff]  ;;  %v991_v26 = vld [vmem:[%s2737_s11 + $0x8] sm:$0xff] }
 0x43d   : > { %1690 = vmatmul.msk.f32.vlgmr.msrb.gmra.mxu3 %vm610_vm5, %v762_v27  ;;  %v990_v27 = vld [vmem:[%s2737_s11] sm:$0xff] }
 0x43e   : > { %v1855_v28 = vld [vmem:[%s2736_s10] ss:$0 sm:$0xff] }
 0x442   : > { %v1882_v29 = vpop.eup %1881 }
 0x443   : > { %v1841_v30 = vpop.permute.xlu2 %1840  ;;  %v763_v33 = vmul.f32 %v1882_v29, %v1874_v17  ;;  %v747_v35 = vpop.xlane.xlu1 %746  ;;  %v1854_v17 = vld [vmem:[#allocation10] ss:$0 sm:$0xff] }
 0x444   : > { %v1842_v31 = vunpack.i.l.bf16 %v1841_v30  ;;  %v1843_v32 = vunpack.i.h.bf16 %v1841_v30  ;;  %1883 = vrcp.f32 %v747_v35 }
 0x446   : > { %838 = vmatpush.msrb.mxu0 %v1842_v31  ;;  %864 = vmatpush.msrb.mxu1 %v1843_v32 }
 0x447   : > { %1691 = vmatmul.msk.f32.vlgmr.msrb.gmra.mxu0 %vm610_vm5, %v763_v33  ;;  %1692 = vmatmul.msk.f32.vlgmr.msrb.gmra.mxu1 %vm610_vm5, %v764_v34 }
 0x44a   : > { %v1884_v36 = vpop.eup %1883 }
 0x44b   : > { %v761_v37 = vmul.f32 %v1884_v36, %v1876_v20  ;;  %v997_v20 = vld [vmem:[%s2737_s11 + $0x38] sm:$0xff] }
 0x44c   : > { %1014 = vmatpush.msra.mxu0 %v997_v20 }
 0x44e   : > { %1015 = vmatpush.msra.mxu0 %v996_v21 }
 0x450   : > { %1016 = vmatpush.msra.mxu0 %v995_v22 }
 0x452   : > { %1017 = vmatpush.msra.mxu0 %v994_v23 }
 0x454   : > { %1018 = vmatpush.msra.mxu0 %v993_v24 }
 0x456   : > { %1019 = vmatpush.msra.mxu0 %v992_v25 }
 0x458   : > { %1020 = vmatpush.msra.mxu0 %v991_v26 }
 0x45a   : > { %1021 = vmatpush.msra.mxu0 %v990_v27 }
 0x45b   : > { %v766_v38 = vpop.permute.xlu1 %765 }
 0x45c   : > { %786 = vmatpush.msra.mxu2 %v766_v38 }
 0x45d   : > { %1689 = vmatmul.msk.f32.vlgmr.msra.gmra.mxu2 %vm610_vm5, %v761_v37 }
 0x45e   : > { %909 = vmatpush.msrb.mxu2 %v889_v42 }
 0x460   : > { %910 = vmatpush.msrb.mxu2 %v888_v43 }
 0x462   : > { %911 = vmatpush.msrb.mxu2 %v887_v44 }
 0x464   : > { %912 = vmatpush.msrb.mxu2 %v886_v45 }
 0x4c0   : > { %v814_v39 = vpop.f32.mrf.mxu3 }
 0x4c1   : > { %870 = vrot.lane.b32.xlu0 %v814_v39, %s2745_s27  ;;  %s2771_s27 = smov 24  }
 0x4c4   : > { %v840_v40 = vpop.f32.mrf.mxu0  ;;  %v866_v41 = vpop.f32.mrf.mxu1 }
 0x4c5   : > { %874 = vrot.lane.b32.xlu2 %v840_v40, %s2747_s16  ;;  %v1856_v40 = vld [vmem:[%s2738_s12] ss:$0 sm:$0xff]  ;;  %s2081_s16 = scalar_lea.hbm %s2739_s13, 16 }
 0x4c9   : > { %878 = vrot.lane.b32.xlu0 %v866_v41, %s2746_s29 }
 0x4e0   : > { %v788_v47 = vpop.f32.mrf.mxu2 }
 0x51f   : > { %v875_v50 = vpop.permute.xlu2 %874 }
 0x533   : > { %v871_v46 = vpop.permute.xlu0 %870 }
 0x534   : > { %v881_v49 = vsel %vm610_vm5, %v788_v47, %v871_v46 }
 0x535   : > { %v883_v52 = vsel %vm882_vm7, %v881_v49, %v875_v50 }
 0x53b   : > { %v879_v51 = vpop.permute.xlu0 %878 }
 0x53c   : > { %v2463_v53 = vsel %vm884_vm8, %v883_v52, %v879_v51  ;;  %v1699_v51 = vld [vmem:[%s2729_s3 + $0x38] sm:$0xff]  ;;  %v1698_v52 = vld [vmem:[%s2729_s3 + $0x30] sm:$0xff] }
 0x53d   : > { %1693 = vmatmul.msk.f32.vlgmr.msrb.gmra.mxu2 %vm532_vm0, %v2463_v53  ;;  %1086 = vmatpush.msra.mxu1 %v1699_v51 }
 0x53f   : > { %1087 = vmatpush.msra.mxu1 %v1698_v52 }
 0x5c0   : > { %v914_v55 = vpop.f32.mrf.mxu2 }
 0x5c1   : > { %v915_v56 = vadd.f32 %v1852_v54, %v914_v55  ;;  %v1697_v54 = vld [vmem:[%s2729_s3 + $0x28] sm:$0xff]  ;;  %v1696_v55 = vld [vmem:[%s2729_s3 + $0x20] sm:$0xff] }
 0x5c2   : > { %1088 = vmatpush.msra.mxu1 %v1697_v54 }
 0x5c3   : > { %v2471_v57 = vadd.f32 %v915_v56, %v2359_v0  ;;  %v952_v0 = vld [vmem:[%s2735_s9 + $0x10] sm:$0xff] }
 0x5c4   : > { %974 = vmatpush.msra.mxu3 %v952_v0  ;;  %1089 = vmatpush.msra.mxu1 %v1696_v55  ;;  %v1857_v0 = vld [vmem:[#allocation5 + $0x1] ss:$0 sm:$0xff] }
 0x5c5   : > { %v920_v58 = vsel %vm532_vm0, %v2471_v57, 0.0 }
 0x5c6   : > { %921 = vadd.xlane.f32.xlu2 %v920_v58  ;;  %975 = vmatpush.msra.mxu3 %v951_v2 }
 0x5c8   : > { %976 = vmatpush.msra.mxu3 %v950_v3 }
 0x639   : > { %v922_v59 = vpop.xlane.xlu2 %921 }
 0x63a   : > { %v923_v60 = vmul.f32 %v922_v59, %v2363_v8 }
 0x63c   : > { %v924_v61 = vsub.f32 %v2471_v57, %v923_v60 }
 0x63e   : > { %v925_v62 = vmul.f32 %v924_v61, %v924_v61 }
 0x640   : > { %v926_v63 = vsel %vm532_vm0, %v925_v62, 0.0 }
 0x641   : > { %927 = vadd.xlane.f32.xlu0 %v926_v63 }
 0x6b4   : > { %v928_v4 = vpop.xlane.xlu0 %927 }
 0x6b5   : > { %v929_v5 = vmul.f32 %v928_v4, %v2363_v8  ;;  %v1858_v4 = vld [vmem:[#allocation7 + $0x1] ss:$0 sm:$0xff] }
 0x6b7   : > { %v930_v6 = vadd.f32 1e-05, %v929_v5 }
 0x6b9   : > { %1885 = vrsqrt.f32 %v930_v6  ;;  %vm937_vm10 = vweird.f32 %v930_v6 }
 0x6bf   : > { %v1886_v7 = vpop.eup %1885 }
 0x6c0   : > { %v932_v9 = vmul.f32 %v1886_v7, %v930_v6  ;;  %vm938_vm9 = vweird.f32 %v1886_v7 }
 0x6c1   : > { %vm939_vm11 = vmor %vm937_vm10, %vm938_vm9 }
 0x6c2   : > { %v933_v10 = vmul.f32 %v1886_v7, %v932_v9 }
 0x6c4   : > { %v934_v11 = vmul.f32 0.5, %v933_v10 }
 0x6c6   : > { %v935_v12 = vsub.f32 1.5, %v934_v11 }
 0x6c8   : > { %v936_v13 = vmul.f32 %v1886_v7, %v935_v12 }
 0x6ca   : > { %v940_v15 = vsel %vm939_vm11, %v1886_v7, %v936_v13  ;;  %v1859_v7 = vld [vmem:[%s2730_s4 + $0x1] ss:$0 sm:$0xff] }
 0x6cb   : > { %v941_v16 = vmul.f32 %v940_v15, %v924_v61 }
 0x6cd   : > { %v945_v18 = vmul.f32 %v1853_v14, %v941_v16 }
 0x6cf   : > { %v949_v19 = vadd.f32 %v1854_v17, %v945_v18 }
 0x6d1   : > { %1694 = vmatmul.msk.f32.vlgmr.msra.gmra.mxu3 %vm532_vm0, %v949_v19 }
 0x754   : > { %v978_v29 = vpop.f32.mrf.mxu3 }
 0x755   : > { %v979_v30 = vadd.f32 %v1855_v28, %v978_v29 }
 0x757   : > { %v981_v31 = vmul.f32 %v979_v30, %v979_v30 }
 0x759   : > { %v982_v32 = vmul.f32 %v981_v31, %v979_v30 }
 0x75b   : > { %v983_v33 = vmul.f32 0.044715, %v982_v32 }
 0x75d   : > { %v984_v34 = vadd.f32 %v983_v33, %v979_v30 }
 0x75f   : > { %v985_v35 = vmul.f32 0.7978846, %v984_v34 }
 0x761   : > { %1887 = vtanh.f32 %v985_v35 }
 0x767   : > { %v1888_v36 = vpop.eup %1887 }
 0x768   : > { %v987_v37 = vadd.f32 1.0, %v1888_v36 }
 0x76a   : > { %v988_v38 = vmul.f32 0.5, %v987_v37 }
 0x76c   : > { %v989_v39 = vmul.f32 %v988_v38, %v979_v30 }
 0x76e   : > { %1695 = vmatmul.msk.f32.vlgmr.msra.gmra.mxu0 %vm1002_vm12, %v989_v39 }
 0x7eb   : > { %v1023_v41 = vpop.f32.mrf.mxu0 }
 0x7ec   : > { %v1024_v42 = vadd.f32 %v1856_v40, %v1023_v41 }
 0x7ee   : > { %v2524_v43 = vadd.f32 %v1024_v42, %v2471_v57 }
 0x7f0   : > { %v1031_v44 = vsel %vm532_vm0, %v2524_v43, 0.0 }
 0x7f1   : > { %1032 = vadd.xlane.f32.xlu1 %v1031_v44 }
 0x864   : > { %v1033_v45 = vpop.xlane.xlu1 %1032 }
 0x865   : > { %v1034_v46 = vmul.f32 %v1033_v45, %v2363_v8 }
 0x867   : > { %v1035_v47 = vsub.f32 %v2524_v43, %v1034_v46 }
 0x869   : > { %v1036_v49 = vmul.f32 %v1035_v47, %v1035_v47 }
 0x86b   : > { %v1037_v50 = vsel %vm532_vm0, %v1036_v49, 0.0 }
 0x86c   : > { %1038 = vadd.xlane.f32.xlu2 %v1037_v50 }
 0x8df   : > { %v1039_v56 = vpop.xlane.xlu2 %1038 }
 0x8e0   : > { %v1040_v57 = vmul.f32 %v1039_v56, %v2363_v8 }
 0x8e2   : > { %v1041_v58 = vadd.f32 1e-05, %v1040_v57 }
 0x8e4   : > { %1889 = vrsqrt.f32 %v1041_v58  ;;  %vm1048_vm14 = vweird.f32 %v1041_v58 }
 0x8ea   : > { %v1890_v59 = vpop.eup %1889 }
 0x8eb   : > { %v1043_v60 = vmul.f32 %v1890_v59, %v1041_v58  ;;  %vm1049_vm13 = vweird.f32 %v1890_v59 }
 0x8ec   : > { %vm1050_vm15 = vmor %vm1048_vm14, %vm1049_vm13 }
 0x8ed   : > { %v1044_v61 = vmul.f32 %v1890_v59, %v1043_v60 }
 0x8ef   : > { %v1045_v62 = vmul.f32 0.5, %v1044_v61 }
 0x8f1   : > { %v1046_v63 = vsub.f32 1.5, %v1045_v62 }
 0x8f3   : > { %v1047_v1 = vmul.f32 %v1890_v59, %v1046_v63 }
 0x8f5   : > { %v1051_v2 = vsel %vm1050_vm15, %v1890_v59, %v1047_v1 }
 0x8f6   : > { %v1052_v3 = vmul.f32 %v1051_v2, %v1035_v47 }
 0x8f8   : > { %v1056_v5 = vmul.f32 %v1857_v0, %v1052_v3 }
 0x8fa   : > { %v1060_v6 = vadd.f32 %v1858_v4, %v1056_v5 }
 0x8fc   : > { %1701 = vmatmul.msk.f32.vlgmr.msra.gmra.mxu1 %vm532_vm0, %v1060_v6 }
 0x979   : > { %v1091_v9 = vpop.f32.mrf.mxu1 }
 0x97a   : > { %v2548_v10 = vadd.f32 %v1859_v7, %v1091_v9 }
 0x97c   : > { %1097 = vrot.lane.b32.xlu2 %v2548_v10, %s2147_s21  ;;  %1095 = vrot.lane.b32.xlu1 %v2548_v10, %s2145_s24  ;;  %s2769_s24 = smov 16   ;;  %s2770_s21 = smov 8  }
 0x97d   : > { %1099 = vrot.lane.b32.xlu0 %v2548_v10, %s2144_s18  ;;  %s2152_s18 = smov 32  }
 0x985   : > { %1101 = vrot.lane.b32.xlu0 %v2548_v10, %s2146_s20 }
 0x9d6   : > { %v2558_v11 = vpop.permute.xlu2 %1097 }
 0x9d7   : > { %1153 = vrot.lane.b32.xlu2 %v2558_v11, %s2146_s20 }
 0x9ee   : > { %v2562_v12 = vpop.permute.xlu1 %1095 }
 0x9ef   : > { %v2564_v13 = vpop.permute.xlu0 %1099  ;;  %1127 = vrot.lane.b32.xlu0 %v2562_v12, %s2146_s20 }
 0x9f0   : > { %1179 = vrot.lane.b32.xlu1 %v2564_v13, %s2146_s20  ;;  %v1844_v56 = vpack.i.bf16 %v2562_v12, %v2564_v13 }
 0x9f7   : > { %v1102_v14 = vpop.permute.xlu0 %1101 }
 0x9f8   : > { %1702 = vmatpush.xpose.msk.msra.mxu2 %vm610_vm5, %v1102_v14  ;;  %v1717_v14 = vld [vmem:[%s2731_s5 + $0x38] sm:$0xff] }
 0x9fb   : > { %1703 = vmatmul.msk.f32.vlgmr.msra.gmra.mxu2 %vm610_vm5, %v2548_v10 }
 0xa31   : > { %v1154_v15 = vpop.permute.xlu2 %1153 }
 0xa32   : > { %1706 = vmatpush.xpose.msk.msrb.mxu1 %vm610_vm5, %v1154_v15  ;;  %v1716_v15 = vld [vmem:[%s2731_s5 + $0x30] sm:$0xff] }
 0xa35   : > { %1707 = vmatmul.msk.f32.vlgmr.msrb.gmra.mxu1 %vm610_vm5, %v2558_v11 }
 0xa61   : > { %v1128_v16 = vpop.permute.xlu0 %1127 }
 0xa62   : > { %v1180_v17 = vpop.permute.xlu1 %1179  ;;  %1704 = vmatpush.xpose.msk.msrb.mxu3 %vm610_vm5, %v1128_v16  ;;  %v1715_v16 = vld [vmem:[%s2731_s5 + $0x28] sm:$0xff] }
 0xa63   : > { %1708 = vmatpush.xpose.msk.msrb.mxu2 %vm610_vm5, %v1180_v17  ;;  %v1714_v17 = vld [vmem:[%s2731_s5 + $0x20] sm:$0xff] }
 0xa65   : > { %1705 = vmatmul.msk.f32.vlgmr.msrb.gmra.mxu3 %vm610_vm5, %v2562_v12 }
 0xa66   : > { %1709 = vmatmul.msk.f32.vlgmr.msrb.gmra.mxu2 %vm610_vm5, %v2564_v13 }
 0xa7e   : > { %v1124_v22 = vpop.f32.mrf.mxu2 }
 0xa7f   : > { %v1205_v31 = vmul.f32 0.35355338, %v1124_v22 }
 0xa81   : > { %v1209_v32 = vsel %vm2415_vm6, %v1205_v31, -1e+30 }
 0xa82   : > { %v1213_v33 = vsel %vm610_vm5, %v1209_v32, -inf }
 0xab2   : > { %v1176_v18 = vpop.f32.mrf.mxu1 }
 0xab3   : > { %v1207_v19 = vmul.f32 0.35355338, %v1176_v18 }
 0xab5   : > { %v1211_v20 = vsel %vm2415_vm6, %v1207_v19, -1e+30 }
 0xab6   : > { %v1219_v21 = vsel %vm610_vm5, %v1211_v20, -inf }
 0xab7   : > { %1220 = vmax.xlane.f32.xlu2 %v1219_v21 }
 0xae8   : > { %v1150_v23 = vpop.f32.mrf.mxu3 }
 0xae9   : > { %v1206_v24 = vmul.f32 0.35355338, %v1150_v23  ;;  %v1202_v25 = vpop.f32.mrf.mxu2 }
 0xaea   : > { %v1208_v26 = vmul.f32 0.35355338, %v1202_v25  ;;  %v1860_v25 = vld [vmem:[%s2732_s6 + $0x1] ss:$0 sm:$0xff] }
 0xaeb   : > { %v1210_v27 = vsel %vm2415_vm6, %v1206_v24, -1e+30 }
 0xaec   : > { %v1212_v28 = vsel %vm2415_vm6, %v1208_v26, -1e+30  ;;  %v1216_v29 = vsel %vm610_vm5, %v1210_v27, -inf }
 0xaed   : > { %v1222_v30 = vsel %vm610_vm5, %v1212_v28, -inf  ;;  %1217 = vmax.xlane.f32.xlu0 %v1216_v29 }
 0xaee   : > { %1223 = vmax.xlane.f32.xlu1 %v1222_v30 }
 0xaf6   : > { %1214 = vmax.xlane.f32.xlu1 %v1213_v33 }
 0xb2a   : > { %v1221_v34 = vpop.xlane.xlu2 %1220 }
 0xb2b   : > { %v1227_v35 = vsub.f32 %v1211_v20, %v1221_v34 }
 0xb2d   : > { %v1233_v36 = vmul.f32 1.442695, %v1227_v35  ;;  %v1723_v35 = vld [vmem:[%s2735_s9 + $0x38] sm:$0xff] }
 0xb2f   : > { %1891 = vpow2.f32 %v1233_v36  ;;  %v1721_v36 = vld [vmem:[%s2735_s9 + $0x28] sm:$0xff] }
 0xb35   : > { %v1892_v37 = vpop.eup %1891 }
 0xb36   : > { %v1243_v38 = vsel %vm610_vm5, %v1892_v37, 0.0 }
 0xb37   : > { %1244 = vadd.xlane.f32.xlu1 %v1243_v38 }
 0xb60   : > { %v1218_v39 = vpop.xlane.xlu0 %1217 }
 0xb61   : > { %v1224_v40 = vpop.xlane.xlu1 %1223  ;;  %v1226_v41 = vsub.f32 %v1210_v27, %v1218_v39 }
 0xb62   : > { %v1228_v42 = vsub.f32 %v1212_v28, %v1224_v40 }
 0xb63   : > { %v1231_v44 = vmul.f32 1.442695, %v1226_v41 }
 0xb64   : > { %v1235_v45 = vmul.f32 1.442695, %v1228_v42 }
 0xb65   : > { %1893 = vpow2.f32 %v1231_v44 }
 0xb66   : > { %1895 = vpow2.f32 %v1235_v45 }
 0xb69   : > { %v1215_v48 = vpop.xlane.xlu1 %1214 }
 0xb6a   : > { %v1225_v46 = vsub.f32 %v1209_v32, %v1215_v48 }
 0xb6b   : > { %v1894_v47 = vpop.eup %1893 }
 0xb6c   : > { %v1896_v49 = vpop.eup %1895  ;;  %v1229_v50 = vmul.f32 1.442695, %v1225_v46  ;;  %v1240_v51 = vsel %vm610_vm5, %v1894_v47, 0.0 }
 0xb6d   : > { %v1246_v52 = vsel %vm610_vm5, %v1896_v49, 0.0  ;;  %1241 = vadd.xlane.f32.xlu2 %v1240_v51  ;;  %v1862_v51 = vld [vmem:[#allocation10 + $0x1] ss:$0 sm:$0xff] }
 0xb6e   : > { %1897 = vpow2.f32 %v1229_v50  ;;  %1247 = vadd.xlane.f32.xlu0 %v1246_v52 }
 0xb74   : > { %v1898_v54 = vpop.eup %1897 }
 0xb75   : > { %v1237_v55 = vsel %vm610_vm5, %v1898_v54, 0.0 }
 0xb76   : > { %1238 = vadd.xlane.f32.xlu1 %v1237_v55  ;;  %v1732_v55 = vld [vmem:[%s2737_s11 + $0x70] sm:$0xff] }
 0xb82   : > { %1845 = vrot.lane.b32.xlu0 %v1844_v56, %s2148_s8  ;;  %v1731_v56 = vld [vmem:[%s2737_s11 + $0x68] sm:$0xff] }
 0xb85   : > { %1309 = vrot.lane.b32.xlu2 %v2558_v11, %s2148_s8 }
 0xb8f   : > { %1257 = vrot.lane.b32.xlu1 %v2548_v10, %s2148_s8 }
 0xb97   : > { %1525 = vrot.lane.b32.xlu1 %v2524_v43, %s2152_s18 }
 0xbaa   : > { %v1245_v57 = vpop.xlane.xlu1 %1244 }
 0xbab   : > { %1899 = vrcp.f32 %v1245_v57  ;;  %v1730_v57 = vld [vmem:[%s2737_s11 + $0x60] sm:$0xff] }
 0xbb1   : > { %v1900_v59 = vpop.eup %1899 }
 0xbb2   : > { %v1255_v60 = vmul.f32 %v1900_v59, %v1892_v37  ;;  %v1720_v37 = vld [vmem:[%s2735_s9 + $0x20] sm:$0xff]  ;;  %v1728_v59 = vld [vmem:[%s2737_s11 + $0x50] sm:$0xff] }
 0xbe0   : > { %v1242_v58 = vpop.xlane.xlu2 %1241 }
 0xbe1   : > { %v1248_v62 = vpop.xlane.xlu0 %1247  ;;  %1901 = vrcp.f32 %v1242_v58  ;;  %v1729_v58 = vld [vmem:[%s2737_s11 + $0x58] sm:$0xff] }
 0xbe2   : > { %1903 = vrcp.f32 %v1248_v62  ;;  %v1863_v62 = vld [vmem:[%s2736_s10 + $0x1] ss:$0 sm:$0xff] }
 0xbe7   : > { %v1902_v63 = vpop.eup %1901 }
 0xbe8   : > { %v1310_v61 = vpop.permute.xlu2 %1309  ;;  %v1904_v1 = vpop.eup %1903  ;;  %v1254_v5 = vmul.f32 %v1902_v63, %v1894_v47  ;;  %v1861_v47 = vld [vmem:[#allocation8 + $0x1] ss:$0 sm:$0xff] }
 0xbe9   : > { %1330 = vmatpush.msra.mxu1 %v1310_v61  ;;  %v1239_v2 = vpop.xlane.xlu1 %1238  ;;  %v1256_v6 = vmul.f32 %v1904_v1, %v1896_v49  ;;  %v1726_v61 = vld [vmem:[%s2737_s11 + $0x40] sm:$0xff] }
 0xbea   : > { %1712 = vmatmul.msk.f32.vlgmr.msra.gmra.mxu1 %vm610_vm5, %v1255_v60  ;;  %1905 = vrcp.f32 %v1239_v2  ;;  %v1727_v60 = vld [vmem:[%s2737_s11 + $0x48] sm:$0xff] }
 0xbf0   : > { %v1906_v7 = vpop.eup %1905 }
 0xbf1   : > { %v1253_v9 = vmul.f32 %v1906_v7, %v1898_v54 }
 0xbf4   : > { %v1846_v0 = vpop.permute.xlu0 %1845 }
 0xbf5   : > { %v1848_v3 = vunpack.i.h.bf16 %v1846_v0  ;;  %v1847_v4 = vunpack.i.l.bf16 %v1846_v0 }
 0xbf7   : > { %1304 = vmatpush.msrb.mxu0 %v1848_v3  ;;  %1356 = vmatpush.msra.mxu2 %v1847_v4 }
 0xbf8   : > { %1711 = vmatmul.msk.f32.vlgmr.msrb.gmra.mxu0 %vm610_vm5, %v1254_v5  ;;  %1713 = vmatmul.msk.f32.vlgmr.msra.gmra.mxu2 %vm610_vm5, %v1256_v6 }
 0xbf9   : > { %1469 = vmatpush.msra.mxu0 %v1723_v35 }
 0xc01   : > { %v1258_v10 = vpop.permute.xlu1 %1257 }
 0xc02   : > { %1278 = vmatpush.msra.mxu3 %v1258_v10 }
 0xc03   : > { %1710 = vmatmul.msk.f32.vlgmr.msra.gmra.mxu3 %vm610_vm5, %v1253_v9 }
 0xc04   : > { %1401 = vmatpush.msrb.mxu3 %v1717_v14 }
 0xc06   : > { %1402 = vmatpush.msrb.mxu3 %v1716_v15 }
 0xc08   : > { %1403 = vmatpush.msrb.mxu3 %v1715_v16 }
 0xc09   : > { %v1526_v15 = vpop.permute.xlu1 %1525 }
 0xc0a   : > { %1404 = vmatpush.msrb.mxu3 %v1714_v17  ;;  %v1535_v17 = vsel %vm532_vm0, %v2463_v53, %v1526_v15 }
 0xc67   : > { %v1332_v11 = vpop.f32.mrf.mxu1 }
 0xc68   : > { %1366 = vrot.lane.b32.xlu2 %v1332_v11, %s2769_s24  ;;  %v1864_v11 = vld [vmem:[%s2738_s12 + $0x1] ss:$0 sm:$0xff] }
 0xc75   : > { %v1306_v12 = vpop.f32.mrf.mxu0 }
 0xc76   : > { %1362 = vrot.lane.b32.xlu0 %v1306_v12, %s2770_s21 }
 0xc7b   : > { %v1358_v13 = vpop.f32.mrf.mxu2 }
 0xc7e   : > { %1370 = vrot.lane.b32.xlu0 %v1358_v13, %s2771_s27 }
 0xc86   : > { %v1280_v19 = vpop.f32.mrf.mxu3 }
 0xcc2   : > { %v1367_v21 = vpop.permute.xlu2 %1366 }
 0xce8   : > { %v1363_v18 = vpop.permute.xlu0 %1362 }
 0xce9   : > { %v1373_v20 = vsel %vm610_vm5, %v1280_v19, %v1363_v18 }
 0xcea   : > { %v1374_v23 = vsel %vm882_vm7, %v1373_v20, %v1367_v21 }
 0xcf0   : > { %v1371_v22 = vpop.permute.xlu0 %1370 }
 0xcf1   : > { %v1375_v24 = vsel %vm884_vm8, %v1374_v23, %v1371_v22 }
 0xcf2   : > { %1528 = vrot.lane.b32.xlu1 %v1375_v24, %s2148_s8  ;;  %1719 = vmatmul.msk.f32.vlgmr.msrb.gmra.mxu3 %vm532_vm0, %v1375_v24  ;;  %s1737_s8 = sshll.u32 %s2247_s15, 3  ;;  %s1541_s15 = scalar_lea.sflag [#allocation4], %s2341_s22 }
 0xcf3   : > { %s1551_s27 = scalar_lea.hbm %s2739_s13, %s1737_s8 }
 0xcf4   : > { %s1555_s2 = sshll.u32 %s1551_s27, 4  ;;  %s1556_s2 = int_to_ptr.hbm [resolvable:$true] %s1555_s2 }
 0xd64   : > { %v1529_v16 = vpop.permute.xlu1 %1528 }
 0xd65   : > { %v1536_v18 = vsel %vm1002_vm12, %v1535_v17, %v1529_v16 }
 0xd75   : > { %v1406_v26 = vpop.f32.mrf.mxu3 }
 0xd76   : > { %v1407_v27 = vadd.f32 %v1860_v25, %v1406_v26 }
 0xd78   : > { %v2634_v28 = vadd.f32 %v1407_v27, %v2524_v43  ;;  %v1722_v43 = vld [vmem:[%s2735_s9 + $0x30] sm:$0xff] }
 0xd79   : > { %1470 = vmatpush.msra.mxu0 %v1722_v43 }
 0xd7a   : > { %v1414_v29 = vsel %vm532_vm0, %v2634_v28, 0.0 }
 0xd7b   : > { %1415 = vadd.xlane.f32.xlu2 %v1414_v29  ;;  %1471 = vmatpush.msra.mxu0 %v1721_v36 }
 0xd7d   : > { %1472 = vmatpush.msra.mxu0 %v1720_v37 }
 0xdee   : > { %v1416_v30 = vpop.xlane.xlu2 %1415 }
 0xdef   : > { %v1417_v31 = vmul.f32 %v1416_v30, %v2363_v8 }
 0xdf1   : > { %v1418_v32 = vsub.f32 %v2634_v28, %v1417_v31 }
 0xdf3   : > { %v1419_v33 = vmul.f32 %v1418_v32, %v1418_v32 }
 0xdf5   : > { %v1420_v34 = vsel %vm532_vm0, %v1419_v33, 0.0 }
 0xdf6   : > { %1421 = vadd.xlane.f32.xlu0 %v1420_v34 }
 0xe69   : > { %v1422_v38 = vpop.xlane.xlu0 %1421 }
 0xe6a   : > { %v1423_v39 = vmul.f32 %v1422_v38, %v2363_v8  ;;  %v1733_v8 = vld [vmem:[%s2737_s11 + $0x78] sm:$0xff] }
 0xe6b   : > { %1511 = vmatpush.msrb.mxu1 %v1733_v8 }
 0xe6c   : > { %v1424_v40 = vadd.f32 1e-05, %v1423_v39 }
 0xe6d   : > { %1512 = vmatpush.msrb.mxu1 %v1732_v55 }
 0xe6e   : > { %1907 = vrsqrt.f32 %v1424_v40  ;;  %vm1431_vm2 = vweird.f32 %v1424_v40 }
 0xe6f   : > { %1513 = vmatpush.msrb.mxu1 %v1731_v56 }
 0xe71   : > { %1514 = vmatpush.msrb.mxu1 %v1730_v57 }
 0xe73   : > { %1515 = vmatpush.msrb.mxu1 %v1729_v58 }
 0xe74   : > { %v1908_v41 = vpop.eup %1907 }
 0xe75   : > { %v1426_v42 = vmul.f32 %v1908_v41, %v1424_v40  ;;  %vm1432_vm1 = vweird.f32 %v1908_v41  ;;  %1516 = vmatpush.msrb.mxu1 %v1728_v59 }
 0xe76   : > { %vm1433_vm3 = vmor %vm1431_vm2, %vm1432_vm1 }
 0xe77   : > { %v1427_v44 = vmul.f32 %v1908_v41, %v1426_v42  ;;  %1517 = vmatpush.msrb.mxu1 %v1727_v60 }
 0xe79   : > { %v1428_v45 = vmul.f32 0.5, %v1427_v44  ;;  %1518 = vmatpush.msrb.mxu1 %v1726_v61 }
 0xe7b   : > { %v1429_v48 = vsub.f32 1.5, %v1428_v45 }
 0xe7d   : > { %v1430_v46 = vmul.f32 %v1908_v41, %v1429_v48 }
 0xe7f   : > { %v1434_v49 = vsel %vm1433_vm3, %v1908_v41, %v1430_v46 }
 0xe80   : > { %v1435_v50 = vmul.f32 %v1434_v49, %v1418_v32 }
 0xe82   : > { %v1439_v52 = vmul.f32 %v1861_v47, %v1435_v50 }
 0xe84   : > { %v1443_v54 = vadd.f32 %v1862_v51, %v1439_v52 }
 0xe86   : > { %1725 = vmatmul.msk.f32.vlgmr.msra.gmra.mxu0 %vm532_vm0, %v1443_v54 }
 0xf03   : > { %v1474_v63 = vpop.f32.mrf.mxu0 }
 0xf04   : > { %v1475_v1 = vadd.f32 %v1863_v62, %v1474_v63 }
 0xf06   : > { %v1477_v0 = vmul.f32 %v1475_v1, %v1475_v1 }
 0xf08   : > { %v1478_v2 = vmul.f32 %v1477_v0, %v1475_v1 }
 0xf0a   : > { %v1479_v3 = vmul.f32 0.044715, %v1478_v2 }
 0xf0c   : > { %v1480_v4 = vadd.f32 %v1479_v3, %v1475_v1 }
 0xf0e   : > { %v1481_v5 = vmul.f32 0.7978846, %v1480_v4 }
 0xf10   : > { %1909 = vtanh.f32 %v1481_v5 }
 0xf16   : > { %v1910_v6 = vpop.eup %1909 }
 0xf17   : > { %v1483_v7 = vadd.f32 1.0, %v1910_v6 }
 0xf19   : > { %v1484_v9 = vmul.f32 0.5, %v1483_v7 }
 0xf1b   : > { %v1485_v10 = vmul.f32 %v1484_v9, %v1475_v1 }
 0xf1d   : > { %1735 = vmatmul.msk.f32.vlgmr.msrb.gmra.mxu1 %vm1002_vm12, %v1485_v10 }
 0xf9a   : > { %v1520_v12 = vpop.f32.mrf.mxu1 }
 0xf9b   : > { %v1521_v13 = vadd.f32 %v1864_v11, %v1520_v12 }
 0xf9d   : > { %v1523_v14 = vadd.f32 %v1521_v13, %v2634_v28 }
 0xf9f   : > { %1532 = vrot.lane.b32.xlu1 %v1523_v14, %s2146_s20  ;;  %s2075_s20 = sshra.s32 %s1556_s2, 4  ;;  %s2076_s20 = int_to_ptr.hbm [resolvable:$true] %s2075_s20 }
 0xfa0   : > { %s2077_s14 = scalar_lea.hbm %s2076_s20, 8  ;;  %p2082_p12 = scmp.lt.s32.totalorder %s2076_s20, %s2739_s13 }
 0xfa1   : > { %p2078_p1 = scmp.ne.s32.totalorder %s2076_s20, %s2077_s14  ;;  %p2083_p7 = scmp.lt.s32.totalorder %s2081_s16, %s2077_s14 }
 0xfa3   : > { %p2079_p3 = pnand %p2078_p1, %p2310_p4  ;;  %p2084_p8 = por %p2083_p7, %p2082_p12 }
 0xfa5   : > { %p2080_p5 = pneg %p2079_p3 }
 0xfa7   : > { %p2085_p9 = pnand %p2084_p8, %p2080_p5 }
0x1011   : > { %v1533_v19 = vpop.permute.xlu1 %1532 }
0x1012   : > { %v1538_v20 = vsel %vm1537_vm4, %v1536_v18, %v1533_v19 }
0x1013   : > { %1539 = vst [vmem:[%s523_s7] sm:$0xff] %v1538_v20 }
0x1014   : > { %2088 = shalt.err (!%p2085_p9)
}
0x1015   : > { %1758 = dma.vmem_to_hbm [thread:$0]  (%p2310_p4), %s1554_s30, 128, %s1556_s2, %s1541_s15  }
0x1016 PF: > { %s1567_s8 = sand.u32 1, %s2123_s25   ;;  %p2774_p10 = scmp.ge.s32.totalorder %s2135_s28, 2 }
0x1017   : > { %s1568_s24 = scalar_lea.sflag [#allocation4], %s1567_s8 }
0x1018   : > { %p1778_p13 = pnand %p2774_p10, %p2314_p6 }
0x101a   : > { %p1779_p11 = pneg %p1778_p13 }
0x101c   : > { %2118 = dma.done.wait (%p1779_p11), %s1568_s24, 128  }
0x101d   : > { %2120 = vsyncadd (%p1779_p11), %s1568_s24, 4294967168  ;;  %s2775_s28 = sld [smem:[#allocation17_spill]]  ;;  %s2778_s25 = smov %s2127_s26 }
0x101e   : > { %s2776_s21 = sld [smem:[#allocation16_spill]] }
0x101f   : > { %s2777_s27 = sld [smem:[#allocation18_spill]] }
0x1023   : > { %p28_p0 = scmp.ge.s32.totalorder %s2775_s28, 4  }
0x1024   : > { %s2779_s26 = smov %s2776_s21 }
0x1025   :  { %30 = sbr.rel (!%p28_p0) target bundleno = 12 (0xc), region = 145 }
0x102a   :  { %1574 = vsyncpa [#allocation3], 1 }
0x102b   :  { %1576 = vsyncpa [#allocation3 + $0x1], 1 }
0x102c   :  { %1577 = vsyncpa [#allocation6], 1 }
0x102d   :  { %1578 = vsyncpa [#allocation9], 1 }
0x102e   :  { %1579 = vsyncpa [#allocation4], 1 }
0x102f   :  { %1581 = vsyncpa [#allocation4 + $0x1], 1 }

</bundles_post_ra>
